<compile_context>
chip_gen: v6e
topology: v6e:2x2x1
jax: 0.10.0
libtpu: 0.0.40
codegen_flags: <defaults>
</compile_context>

<pallas_src>
import math

import jax
import jax.numpy as jnp
from jax.experimental import pallas as pl
from jax.experimental.pallas import tpu as pltpu


def _round_up(x, m):
    return ((x + m - 1) // m) * m


# ----------------------------------------------------------------------------
# Fused multi-layer LSTM + fc kernel (single invocation, everything in VMEM).
# ----------------------------------------------------------------------------
def _make_fused_lstm_kernel(L, T, Bp, H, Gp, unroll):
    """Gate layout is compact: [i|f|g|o] contiguous in Gp = round_up(4H,128) lanes."""

    def kernel(*refs):
        x_ref = refs[0]                       # (T*Bp, Ip)
        w_refs = refs[1:1 + 3 * L]            # per layer: wih (K,Gp), whh (H,Gp), bias (1,Gp)
        fcw_ref = refs[1 + 3 * L]             # (H, Cp)
        fcb_ref = refs[2 + 3 * L]             # (1, Cp)
        out_ref = refs[3 + 3 * L]             # (Bp, Cp)
        gi_ref = refs[4 + 3 * L]              # scratch (T*Bp, Gp)
        seq_refs = refs[5 + 3 * L:]           # two scratch (T*Bp, H) ping-pong

        def run_layer(l, in_2d, out_seq_ref):
            wih = w_refs[3 * l][...]          # (K, Gp)
            whh = w_refs[3 * l + 1][...]      # (H, Gp)
            bias = w_refs[3 * l + 2][...]     # (1, Gp)  (= b_ih + b_hh, folded)

            # Hoisted input projection: one large MXU matmul over all timesteps.
            gi_ref[...] = (
                jnp.dot(in_2d, wih, preferred_element_type=jnp.float32) + bias
            )

            def step(t, carry):
                h, c = carry                                   # (Bp, H) each
                row = pl.multiple_of(t * Bp, Bp)
                gates = gi_ref[pl.ds(row, Bp), :] + jnp.dot(
                    h, whh, preferred_element_type=jnp.float32)  # (Bp, Gp)
                # One sigmoid over the whole compact tile; tanh only on g block.
                s = jax.nn.sigmoid(gates)
                i_g = s[:, 0 * H:1 * H]
                f_g = s[:, 1 * H:2 * H]
                o_g = s[:, 3 * H:4 * H]
                g_g = jnp.tanh(gates[:, 2 * H:3 * H])
                c_new = f_g * c + i_g * g_g
                h_new = o_g * jnp.tanh(c_new)
                if out_seq_ref is not None:        # last layer: no seq store
                    out_seq_ref[pl.ds(row, Bp), :] = h_new
                return h_new, c_new

            zeros = jnp.zeros((Bp, H), jnp.float32)
            h_last, _ = jax.lax.fori_loop(0, T, step, (zeros, zeros),
                                          unroll=unroll)
            return h_last

        h_last = None
        for l in range(L):
            in_2d = x_ref[...] if l == 0 else seq_refs[(l - 1) % 2][...]
            out_seq_ref = seq_refs[l % 2] if l < L - 1 else None
            h_last = run_layer(l, in_2d, out_seq_ref)

        # Fused final Linear on the last timestep's hidden state (lane-dense).
        out_ref[...] = (
            jnp.dot(h_last, fcw_ref[...], preferred_element_type=jnp.float32)
            + fcb_ref[...]
        )

    return kernel


# ----------------------------------------------------------------------------
# Host-side weight packing — run ONCE per parameter set and cache the result.
# ----------------------------------------------------------------------------
def pack_params(params):
    """Transpose / zero-pad PyTorch-layout weights to the kernel layout.

    Compact gate packing: (4H, K) -> (K_pad, Gp) with gates contiguous.
    Zero-padding of the K rows / trailing lanes is what keeps padded input
    features mathematically inert (see padding invariant note in the wrapper).
    """
    layers = params["layers"]
    fc_w, fc_b = params["fc_w"], params["fc_b"]
    H = layers[0]["whh"].shape[1]
    I = layers[0]["wih"].shape[1]
    C = fc_w.shape[0]
    Ip = _round_up(I, 128)
    Gp = _round_up(4 * H, 128)
    Cp = _round_up(C, 128)

    def pack_w(w, k_pad):
        four_h, in_dim = w.shape
        out = jnp.zeros((k_pad, Gp), jnp.float32)
        return out.at[:in_dim, :four_h].set(w.T.astype(jnp.float32))

    def pack_b(b):
        out = jnp.zeros((1, Gp), jnp.float32)
        return out.at[0, :b.shape[0]].set(b.astype(jnp.float32))

    packed_layers = []
    for l, layer in enumerate(layers):
        k_pad = Ip if l == 0 else H
        packed_layers.append(dict(
            wih=pack_w(layer["wih"], k_pad),
            whh=pack_w(layer["whh"], H),
            # All four nn.LSTM biases add; fold b_ih + b_hh into one vector.
            bias=pack_b(layer["bih"] + layer["bhh"]),
        ))
    fcw_p = jnp.zeros((H, Cp), jnp.float32).at[:, :C].set(fc_w.T.astype(jnp.float32))
    fcb_p = jnp.zeros((1, Cp), jnp.float32).at[0, :C].set(fc_b.astype(jnp.float32))
    return dict(layers=packed_layers, fcw=fcw_p, fcb=fcb_p)


# ----------------------------------------------------------------------------
# Full PhysiLSTM forward (Pallas).
# ----------------------------------------------------------------------------
def physi_lstm_forward(x, packed, *, n_classes):
    """x: (B, T, input_size) batch-first; packed = pack_params(params)."""
    layers = packed["layers"]
    L = len(layers)
    B, T, _ = x.shape
    H = layers[0]["whh"].shape[0]
    Gp = layers[0]["whh"].shape[1]
    Ip = layers[0]["wih"].shape[0]
    Cp = packed["fcw"].shape[1]
    C = n_classes
    Bp = _round_up(B, 8)

    # Time-major, pad batch (sublanes) / feature (lanes), flatten to one 2D slab.
    # PADDING INVARIANT: the math for real rows is exact only because h0=c0=0,
    # padded feature lanes hit zero-padded weight rows, and padded batch rows
    # produce bias-driven garbage that is sliced off at the end.  This breaks if
    # nonzero initial states or in-kernel noise/dropout are ever introduced.
    x_tm = jnp.transpose(x, (1, 0, 2)).astype(jnp.float32)
    x_tm = jnp.pad(x_tm, ((0, 0), (0, Bp - B), (0, Ip - x.shape[2])))
    x2d = x_tm.reshape(T * Bp, Ip)

    args = [x2d]
    for layer in layers:
        args += [layer["wih"], layer["whh"], layer["bias"]]
    args += [packed["fcw"], packed["fcb"]]

    unroll = True if T <= 16 else 4
    kernel = _make_fused_lstm_kernel(L, T, Bp, H, Gp, unroll)

    # Static VMEM budget (everything resident) + advisory cost estimate.
    weight_elems = sum(math.prod(a.shape) for a in args[1:])
    resident_elems = (T * Bp * Ip) + weight_elems + (Bp * Cp) \
        + (T * Bp * Gp) + 2 * (T * Bp * H)
    vmem_limit = int(min(64 * 2**20, max(16 * 2**20, 4 * resident_elems * 4)))

    flops = 2 * Bp * H * Cp
    transcendentals = 0
    for l in range(L):
        K = Ip if l == 0 else H
        flops += 2 * T * Bp * K * Gp + 2 * T * Bp * H * Gp
        transcendentals += T * Bp * (Gp + 2 * H)
    cost = pl.CostEstimate(flops=int(flops),
                           transcendentals=int(transcendentals),
                           bytes_accessed=int(4 * resident_elems))

    out_pad = pl.pallas_call(
        kernel,
        out_shape=jax.ShapeDtypeStruct((Bp, Cp), jnp.float32),
        scratch_shapes=[
            pltpu.VMEM((T * Bp, Gp), jnp.float32),   # hoisted input projections
            pltpu.VMEM((T * Bp, H), jnp.float32),    # inter-layer sequence (ping)
            pltpu.VMEM((T * Bp, H), jnp.float32),    # inter-layer sequence (pong)
        ],
        compiler_params=pltpu.CompilerParams(vmem_limit_bytes=vmem_limit),
        cost_estimate=cost,
    )(*args)
    return out_pad[:B, :C]


# ----------------------------------------------------------------------------
# Pure-JAX reference (matches torch.nn.LSTM / nn.Linear semantics).
# ----------------------------------------------------------------------------
def physi_lstm_reference(x, params):
    seq = jnp.transpose(x, (1, 0, 2)).astype(jnp.float32)   # (T, B, I)
    B = seq.shape[1]
    for layer in params["layers"]:
        wih, whh = layer["wih"], layer["whh"]
        bih, bhh = layer["bih"], layer["bhh"]
        H = whh.shape[1]

        def step(carry, x_t, wih=wih, whh=whh, bih=bih, bhh=bhh, H=H):
            h, c = carry
            g = x_t @ wih.T + bih + h @ whh.T + bhh
            i = jax.nn.sigmoid(g[:, :H])
            f = jax.nn.sigmoid(g[:, H:2 * H])
            gg = jnp.tanh(g[:, 2 * H:3 * H])
            o = jax.nn.sigmoid(g[:, 3 * H:])
            c_new = f * c + i * gg
            h_new = o * jnp.tanh(c_new)
            return (h_new, c_new), h_new

        init = (jnp.zeros((B, H), jnp.float32), jnp.zeros((B, H), jnp.float32))
        _, seq = jax.lax.scan(step, init, seq)
    return seq[-1] @ params["fc_w"].T + params["fc_b"]


# ----------------------------------------------------------------------------
# Deterministic parameter init (nn.LSTM / nn.Linear shapes).
# ----------------------------------------------------------------------------
def init_params(key, config):
    I = config["input_size"]
    H = config["hidden_size"]
    L = config["n_blocks"]
    C = config["n_classes"]
    bound = 1.0 / float(H) ** 0.5

    layers = []
    for l in range(L):
        in_dim = I if l == 0 else H
        key, k1, k2, k3, k4 = jax.random.split(key, 5)
        layers.append(dict(
            wih=jax.random.uniform(k1, (4 * H, in_dim), jnp.float32, -bound, bound),
            whh=jax.random.uniform(k2, (4 * H, H), jnp.float32, -bound, bound),
            bih=jax.random.uniform(k3, (4 * H,), jnp.float32, -bound, bound),
            bhh=jax.random.uniform(k4, (4 * H,), jnp.float32, -bound, bound),
        ))

    key, k1, k2 = jax.random.split(key, 3)
    fc_w = jax.random.uniform(k1, (C, H), jnp.float32, -bound, bound)
    fc_b = jax.random.uniform(k2, (C,), jnp.float32, -bound, bound)
    return dict(layers=layers, fc_w=fc_w, fc_b=fc_b)


if __name__ == "__main__":
    config = dict(input_size=16, hidden_size=32, n_blocks=2, drop_out=0.0, n_classes=4)
    B, T = 2, 8

    key = jax.random.PRNGKey(0)
    key, xk = jax.random.split(key)
    x = jax.random.normal(xk, (B, T, config["input_size"]), jnp.float32)

    params = init_params(key, config)

    # Pack once, reuse across calls (host-side repacking per forward was the
    # dominant dispatch-side cost at these shapes).
    packed = jax.tree_util.tree_map(jax.block_until_ready, pack_params(params))
    fwd = jax.jit(physi_lstm_forward, static_argnames=("n_classes",))

    logits = jax.block_until_ready(fwd(x, packed, n_classes=config["n_classes"]))
    ref = jax.block_until_ready(physi_lstm_reference(x, params))

    assert logits.shape == (B, config["n_classes"])
    assert jnp.allclose(logits, ref, rtol=1e-4, atol=1e-4), (logits, ref)
    print("KERNEL_OK")
</pallas_src>

<mosaic_0001>
module attributes {stable_mosaic.version = 11 : i64} {
  func.func @kernel(%arg0: memref<64x128xf32, #tpu.memory_space<vmem>>, %arg1: memref<128x128xf32, #tpu.memory_space<vmem>>, %arg2: memref<32x128xf32, #tpu.memory_space<vmem>>, %arg3: memref<1x128xf32, #tpu.memory_space<vmem>>, %arg4: memref<32x128xf32, #tpu.memory_space<vmem>>, %arg5: memref<32x128xf32, #tpu.memory_space<vmem>>, %arg6: memref<1x128xf32, #tpu.memory_space<vmem>>, %arg7: memref<32x128xf32, #tpu.memory_space<vmem>>, %arg8: memref<1x128xf32, #tpu.memory_space<vmem>>, %arg9: memref<8x128xf32, #tpu.memory_space<vmem>>, %arg10: memref<64x128xf32, #tpu.memory_space<vmem>>, %arg11: memref<64x32xf32, #tpu.memory_space<vmem>>, %arg12: memref<64x32xf32, #tpu.memory_space<vmem>>) attributes {dimension_semantics = [], scalar_prefetch = 0 : i64, scratch_operands = 3 : i64, tpu.core_type = #tpu.core_type<tc>} {
    %c0 = arith.constant 0 : index
    %c0_0 = arith.constant 0 : index
    %0 = vector.load %arg0[%c0, %c0_0] : memref<64x128xf32, #tpu.memory_space<vmem>>, vector<64x128xf32>
    %c0_1 = arith.constant 0 : index
    %c0_2 = arith.constant 0 : index
    %1 = vector.load %arg1[%c0_1, %c0_2] : memref<128x128xf32, #tpu.memory_space<vmem>>, vector<128x128xf32>
    %c0_3 = arith.constant 0 : index
    %c0_4 = arith.constant 0 : index
    %2 = vector.load %arg2[%c0_3, %c0_4] : memref<32x128xf32, #tpu.memory_space<vmem>>, vector<32x128xf32>
    %c0_5 = arith.constant 0 : index
    %c0_6 = arith.constant 0 : index
    %3 = vector.load %arg3[%c0_5, %c0_6] : memref<1x128xf32, #tpu.memory_space<vmem>>, vector<1x128xf32>
    %cst = arith.constant dense<0.000000e+00> : vector<64x128xf32>
    %4 = tpu.matmul %0, %1, %cst {dimension_numbers = #tpu.dot_dimension_numbers<[1], [0], [0], [1], [0, 0, 1, 1], [], []>} : vector<64x128xf32>, vector<128x128xf32>, vector<64x128xf32> -> vector<64x128xf32>
    %5 = vector.broadcast %3 : vector<1x128xf32> to vector<64x128xf32>
    %6 = arith.addf %4, %5 : vector<64x128xf32>
    %c0_7 = arith.constant 0 : index
    %c0_8 = arith.constant 0 : index
    %7 = vector.load %arg10[%c0_7, %c0_8] : memref<64x128xf32, #tpu.memory_space<vmem>>, vector<64x128xf32>
    tpu.vector_store %arg10[%c0_7, %c0_8], %6 {strides = array<i32>} : memref<64x128xf32, #tpu.memory_space<vmem>>, vector<64x128xf32>,
    %cst_9 = arith.constant 0.000000e+00 : f32
    %8 = vector.broadcast %cst_9 : f32 to vector<8x32xf32>
    %c0_i32 = arith.constant 0 : i32
    %c8_i32 = arith.constant 8 : i32
    %9 = arith.muli %c0_i32, %c8_i32 : i32
    %10 = tpu.assume_multiple %9, 8 : i32
    %11 = arith.index_cast %10 : i32 to index
    %c0_10 = arith.constant 0 : index
    %12 = vector.load %arg10[%11, %c0_10] : memref<64x128xf32, #tpu.memory_space<vmem>>, vector<8x128xf32>
    %cst_11 = arith.constant dense<0.000000e+00> : vector<8x128xf32>
    %13 = tpu.matmul %8, %2, %cst_11 {dimension_numbers = #tpu.dot_dimension_numbers<[1], [0], [0], [1], [0, 0, 1, 1], [], []>} : vector<8x32xf32>, vector<32x128xf32>, vector<8x128xf32> -> vector<8x128xf32>
    %14 = arith.addf %12, %13 : vector<8x128xf32>
    %15 = arith.negf %14 : vector<8x128xf32>
    %16 = math.exp %15 : vector<8x128xf32>
    %cst_12 = arith.constant 1.000000e+00 : f32
    %17 = vector.broadcast %cst_12 : f32 to vector<8x128xf32>
    %18 = arith.addf %17, %16 : vector<8x128xf32>
    %19 = arith.divf %17, %18 : vector<8x128xf32>
    %20 = vector.extract_strided_slice %19 {offsets = [0, 0], sizes = [8, 32], strides = [1, 1]} : vector<8x128xf32> to vector<8x32xf32>
    %21 = vector.extract_strided_slice %19 {offsets = [0, 32], sizes = [8, 32], strides = [1, 1]} : vector<8x128xf32> to vector<8x32xf32>
    %22 = vector.extract_strided_slice %19 {offsets = [0, 96], sizes = [8, 32], strides = [1, 1]} : vector<8x128xf32> to vector<8x32xf32>
    %23 = vector.extract_strided_slice %14 {offsets = [0, 64], sizes = [8, 32], strides = [1, 1]} : vector<8x128xf32> to vector<8x32xf32>
    %24 = math.tanh %23 : vector<8x32xf32>
    %25 = arith.mulf %21, %8 : vector<8x32xf32>
    %26 = arith.mulf %20, %24 : vector<8x32xf32>
    %27 = arith.addf %25, %26 : vector<8x32xf32>
    %28 = math.tanh %27 : vector<8x32xf32>
    %29 = arith.mulf %22, %28 : vector<8x32xf32>
    %30 = arith.index_cast %10 : i32 to index
    %c0_13 = arith.constant 0 : index
    %31 = vector.load %arg11[%30, %c0_13] : memref<64x32xf32, #tpu.memory_space<vmem>>, vector<8x32xf32>
    tpu.vector_store %arg11[%30, %c0_13], %29 {strides = array<i32>} : memref<64x32xf32, #tpu.memory_space<vmem>>, vector<8x32xf32>,
    %c1_i32 = arith.constant 1 : i32
    %c8_i32_14 = arith.constant 8 : i32
    %32 = arith.muli %c1_i32, %c8_i32_14 : i32
    %33 = tpu.assume_multiple %32, 8 : i32
    %34 = arith.index_cast %33 : i32 to index
    %c0_15 = arith.constant 0 : index
    %35 = vector.load %arg10[%34, %c0_15] : memref<64x128xf32, #tpu.memory_space<vmem>>, vector<8x128xf32>
    %cst_16 = arith.constant dense<0.000000e+00> : vector<8x128xf32>
    %36 = tpu.matmul %29, %2, %cst_16 {dimension_numbers = #tpu.dot_dimension_numbers<[1], [0], [0], [1], [0, 0, 1, 1], [], []>} : vector<8x32xf32>, vector<32x128xf32>, vector<8x128xf32> -> vector<8x128xf32>
    %37 = arith.addf %35, %36 : vector<8x128xf32>
    %38 = arith.negf %37 : vector<8x128xf32>
    %39 = math.exp %38 : vector<8x128xf32>
    %cst_17 = arith.constant 1.000000e+00 : f32
    %40 = vector.broadcast %cst_17 : f32 to vector<8x128xf32>
    %41 = arith.addf %40, %39 : vector<8x128xf32>
    %42 = arith.divf %40, %41 : vector<8x128xf32>
    %43 = vector.extract_strided_slice %42 {offsets = [0, 0], sizes = [8, 32], strides = [1, 1]} : vector<8x128xf32> to vector<8x32xf32>
    %44 = vector.extract_strided_slice %42 {offsets = [0, 32], sizes = [8, 32], strides = [1, 1]} : vector<8x128xf32> to vector<8x32xf32>
    %45 = vector.extract_strided_slice %42 {offsets = [0, 96], sizes = [8, 32], strides = [1, 1]} : vector<8x128xf32> to vector<8x32xf32>
    %46 = vector.extract_strided_slice %37 {offsets = [0, 64], sizes = [8, 32], strides = [1, 1]} : vector<8x128xf32> to vector<8x32xf32>
    %47 = math.tanh %46 : vector<8x32xf32>
    %48 = arith.mulf %44, %27 : vector<8x32xf32>
    %49 = arith.mulf %43, %47 : vector<8x32xf32>
    %50 = arith.addf %48, %49 : vector<8x32xf32>
    %51 = math.tanh %50 : vector<8x32xf32>
    %52 = arith.mulf %45, %51 : vector<8x32xf32>
    %53 = arith.index_cast %33 : i32 to index
    %c0_18 = arith.constant 0 : index
    %54 = vector.load %arg11[%53, %c0_18] : memref<64x32xf32, #tpu.memory_space<vmem>>, vector<8x32xf32>
    tpu.vector_store %arg11[%53, %c0_18], %52 {strides = array<i32>} : memref<64x32xf32, #tpu.memory_space<vmem>>, vector<8x32xf32>,
    %c2_i32 = arith.constant 2 : i32
    %c8_i32_19 = arith.constant 8 : i32
    %55 = arith.muli %c2_i32, %c8_i32_19 : i32
    %56 = tpu.assume_multiple %55, 8 : i32
    %57 = arith.index_cast %56 : i32 to index
    %c0_20 = arith.constant 0 : index
    %58 = vector.load %arg10[%57, %c0_20] : memref<64x128xf32, #tpu.memory_space<vmem>>, vector<8x128xf32>
    %cst_21 = arith.constant dense<0.000000e+00> : vector<8x128xf32>
    %59 = tpu.matmul %52, %2, %cst_21 {dimension_numbers = #tpu.dot_dimension_numbers<[1], [0], [0], [1], [0, 0, 1, 1], [], []>} : vector<8x32xf32>, vector<32x128xf32>, vector<8x128xf32> -> vector<8x128xf32>
    %60 = arith.addf %58, %59 : vector<8x128xf32>
    %61 = arith.negf %60 : vector<8x128xf32>
    %62 = math.exp %61 : vector<8x128xf32>
    %cst_22 = arith.constant 1.000000e+00 : f32
    %63 = vector.broadcast %cst_22 : f32 to vector<8x128xf32>
    %64 = arith.addf %63, %62 : vector<8x128xf32>
    %65 = arith.divf %63, %64 : vector<8x128xf32>
    %66 = vector.extract_strided_slice %65 {offsets = [0, 0], sizes = [8, 32], strides = [1, 1]} : vector<8x128xf32> to vector<8x32xf32>
    %67 = vector.extract_strided_slice %65 {offsets = [0, 32], sizes = [8, 32], strides = [1, 1]} : vector<8x128xf32> to vector<8x32xf32>
    %68 = vector.extract_strided_slice %65 {offsets = [0, 96], sizes = [8, 32], strides = [1, 1]} : vector<8x128xf32> to vector<8x32xf32>
    %69 = vector.extract_strided_slice %60 {offsets = [0, 64], sizes = [8, 32], strides = [1, 1]} : vector<8x128xf32> to vector<8x32xf32>
    %70 = math.tanh %69 : vector<8x32xf32>
    %71 = arith.mulf %67, %50 : vector<8x32xf32>
    %72 = arith.mulf %66, %70 : vector<8x32xf32>
    %73 = arith.addf %71, %72 : vector<8x32xf32>
    %74 = math.tanh %73 : vector<8x32xf32>
    %75 = arith.mulf %68, %74 : vector<8x32xf32>
    %76 = arith.index_cast %56 : i32 to index
    %c0_23 = arith.constant 0 : index
    %77 = vector.load %arg11[%76, %c0_23] : memref<64x32xf32, #tpu.memory_space<vmem>>, vector<8x32xf32>
    tpu.vector_store %arg11[%76, %c0_23], %75 {strides = array<i32>} : memref<64x32xf32, #tpu.memory_space<vmem>>, vector<8x32xf32>,
    %c3_i32 = arith.constant 3 : i32
    %c8_i32_24 = arith.constant 8 : i32
    %78 = arith.muli %c3_i32, %c8_i32_24 : i32
    %79 = tpu.assume_multiple %78, 8 : i32
    %80 = arith.index_cast %79 : i32 to index
    %c0_25 = arith.constant 0 : index
    %81 = vector.load %arg10[%80, %c0_25] : memref<64x128xf32, #tpu.memory_space<vmem>>, vector<8x128xf32>
    %cst_26 = arith.constant dense<0.000000e+00> : vector<8x128xf32>
    %82 = tpu.matmul %75, %2, %cst_26 {dimension_numbers = #tpu.dot_dimension_numbers<[1], [0], [0], [1], [0, 0, 1, 1], [], []>} : vector<8x32xf32>, vector<32x128xf32>, vector<8x128xf32> -> vector<8x128xf32>
    %83 = arith.addf %81, %82 : vector<8x128xf32>
    %84 = arith.negf %83 : vector<8x128xf32>
    %85 = math.exp %84 : vector<8x128xf32>
    %cst_27 = arith.constant 1.000000e+00 : f32
    %86 = vector.broadcast %cst_27 : f32 to vector<8x128xf32>
    %87 = arith.addf %86, %85 : vector<8x128xf32>
    %88 = arith.divf %86, %87 : vector<8x128xf32>
    %89 = vector.extract_strided_slice %88 {offsets = [0, 0], sizes = [8, 32], strides = [1, 1]} : vector<8x128xf32> to vector<8x32xf32>
    %90 = vector.extract_strided_slice %88 {offsets = [0, 32], sizes = [8, 32], strides = [1, 1]} : vector<8x128xf32> to vector<8x32xf32>
    %91 = vector.extract_strided_slice %88 {offsets = [0, 96], sizes = [8, 32], strides = [1, 1]} : vector<8x128xf32> to vector<8x32xf32>
    %92 = vector.extract_strided_slice %83 {offsets = [0, 64], sizes = [8, 32], strides = [1, 1]} : vector<8x128xf32> to vector<8x32xf32>
    %93 = math.tanh %92 : vector<8x32xf32>
    %94 = arith.mulf %90, %73 : vector<8x32xf32>
    %95 = arith.mulf %89, %93 : vector<8x32xf32>
    %96 = arith.addf %94, %95 : vector<8x32xf32>
    %97 = math.tanh %96 : vector<8x32xf32>
    %98 = arith.mulf %91, %97 : vector<8x32xf32>
    %99 = arith.index_cast %79 : i32 to index
    %c0_28 = arith.constant 0 : index
    %100 = vector.load %arg11[%99, %c0_28] : memref<64x32xf32, #tpu.memory_space<vmem>>, vector<8x32xf32>
    tpu.vector_store %arg11[%99, %c0_28], %98 {strides = array<i32>} : memref<64x32xf32, #tpu.memory_space<vmem>>, vector<8x32xf32>,
    %c4_i32 = arith.constant 4 : i32
    %c8_i32_29 = arith.constant 8 : i32
    %101 = arith.muli %c4_i32, %c8_i32_29 : i32
    %102 = tpu.assume_multiple %101, 8 : i32
    %103 = arith.index_cast %102 : i32 to index
    %c0_30 = arith.constant 0 : index
    %104 = vector.load %arg10[%103, %c0_30] : memref<64x128xf32, #tpu.memory_space<vmem>>, vector<8x128xf32>
    %cst_31 = arith.constant dense<0.000000e+00> : vector<8x128xf32>
    %105 = tpu.matmul %98, %2, %cst_31 {dimension_numbers = #tpu.dot_dimension_numbers<[1], [0], [0], [1], [0, 0, 1, 1], [], []>} : vector<8x32xf32>, vector<32x128xf32>, vector<8x128xf32> -> vector<8x128xf32>
    %106 = arith.addf %104, %105 : vector<8x128xf32>
    %107 = arith.negf %106 : vector<8x128xf32>
    %108 = math.exp %107 : vector<8x128xf32>
    %cst_32 = arith.constant 1.000000e+00 : f32
    %109 = vector.broadcast %cst_32 : f32 to vector<8x128xf32>
    %110 = arith.addf %109, %108 : vector<8x128xf32>
    %111 = arith.divf %109, %110 : vector<8x128xf32>
    %112 = vector.extract_strided_slice %111 {offsets = [0, 0], sizes = [8, 32], strides = [1, 1]} : vector<8x128xf32> to vector<8x32xf32>
    %113 = vector.extract_strided_slice %111 {offsets = [0, 32], sizes = [8, 32], strides = [1, 1]} : vector<8x128xf32> to vector<8x32xf32>
    %114 = vector.extract_strided_slice %111 {offsets = [0, 96], sizes = [8, 32], strides = [1, 1]} : vector<8x128xf32> to vector<8x32xf32>
    %115 = vector.extract_strided_slice %106 {offsets = [0, 64], sizes = [8, 32], strides = [1, 1]} : vector<8x128xf32> to vector<8x32xf32>
    %116 = math.tanh %115 : vector<8x32xf32>
    %117 = arith.mulf %113, %96 : vector<8x32xf32>
    %118 = arith.mulf %112, %116 : vector<8x32xf32>
    %119 = arith.addf %117, %118 : vector<8x32xf32>
    %120 = math.tanh %119 : vector<8x32xf32>
    %121 = arith.mulf %114, %120 : vector<8x32xf32>
    %122 = arith.index_cast %102 : i32 to index
    %c0_33 = arith.constant 0 : index
    %123 = vector.load %arg11[%122, %c0_33] : memref<64x32xf32, #tpu.memory_space<vmem>>, vector<8x32xf32>
    tpu.vector_store %arg11[%122, %c0_33], %121 {strides = array<i32>} : memref<64x32xf32, #tpu.memory_space<vmem>>, vector<8x32xf32>,
    %c5_i32 = arith.constant 5 : i32
    %c8_i32_34 = arith.constant 8 : i32
    %124 = arith.muli %c5_i32, %c8_i32_34 : i32
    %125 = tpu.assume_multiple %124, 8 : i32
    %126 = arith.index_cast %125 : i32 to index
    %c0_35 = arith.constant 0 : index
    %127 = vector.load %arg10[%126, %c0_35] : memref<64x128xf32, #tpu.memory_space<vmem>>, vector<8x128xf32>
    %cst_36 = arith.constant dense<0.000000e+00> : vector<8x128xf32>
    %128 = tpu.matmul %121, %2, %cst_36 {dimension_numbers = #tpu.dot_dimension_numbers<[1], [0], [0], [1], [0, 0, 1, 1], [], []>} : vector<8x32xf32>, vector<32x128xf32>, vector<8x128xf32> -> vector<8x128xf32>
    %129 = arith.addf %127, %128 : vector<8x128xf32>
    %130 = arith.negf %129 : vector<8x128xf32>
    %131 = math.exp %130 : vector<8x128xf32>
    %cst_37 = arith.constant 1.000000e+00 : f32
    %132 = vector.broadcast %cst_37 : f32 to vector<8x128xf32>
    %133 = arith.addf %132, %131 : vector<8x128xf32>
    %134 = arith.divf %132, %133 : vector<8x128xf32>
    %135 = vector.extract_strided_slice %134 {offsets = [0, 0], sizes = [8, 32], strides = [1, 1]} : vector<8x128xf32> to vector<8x32xf32>
    %136 = vector.extract_strided_slice %134 {offsets = [0, 32], sizes = [8, 32], strides = [1, 1]} : vector<8x128xf32> to vector<8x32xf32>
    %137 = vector.extract_strided_slice %134 {offsets = [0, 96], sizes = [8, 32], strides = [1, 1]} : vector<8x128xf32> to vector<8x32xf32>
    %138 = vector.extract_strided_slice %129 {offsets = [0, 64], sizes = [8, 32], strides = [1, 1]} : vector<8x128xf32> to vector<8x32xf32>
    %139 = math.tanh %138 : vector<8x32xf32>
    %140 = arith.mulf %136, %119 : vector<8x32xf32>
    %141 = arith.mulf %135, %139 : vector<8x32xf32>
    %142 = arith.addf %140, %141 : vector<8x32xf32>
    %143 = math.tanh %142 : vector<8x32xf32>
    %144 = arith.mulf %137, %143 : vector<8x32xf32>
    %145 = arith.index_cast %125 : i32 to index
    %c0_38 = arith.constant 0 : index
    %146 = vector.load %arg11[%145, %c0_38] : memref<64x32xf32, #tpu.memory_space<vmem>>, vector<8x32xf32>
    tpu.vector_store %arg11[%145, %c0_38], %144 {strides = array<i32>} : memref<64x32xf32, #tpu.memory_space<vmem>>, vector<8x32xf32>,
    %c6_i32 = arith.constant 6 : i32
    %c8_i32_39 = arith.constant 8 : i32
    %147 = arith.muli %c6_i32, %c8_i32_39 : i32
    %148 = tpu.assume_multiple %147, 8 : i32
    %149 = arith.index_cast %148 : i32 to index
    %c0_40 = arith.constant 0 : index
    %150 = vector.load %arg10[%149, %c0_40] : memref<64x128xf32, #tpu.memory_space<vmem>>, vector<8x128xf32>
    %cst_41 = arith.constant dense<0.000000e+00> : vector<8x128xf32>
    %151 = tpu.matmul %144, %2, %cst_41 {dimension_numbers = #tpu.dot_dimension_numbers<[1], [0], [0], [1], [0, 0, 1, 1], [], []>} : vector<8x32xf32>, vector<32x128xf32>, vector<8x128xf32> -> vector<8x128xf32>
    %152 = arith.addf %150, %151 : vector<8x128xf32>
    %153 = arith.negf %152 : vector<8x128xf32>
    %154 = math.exp %153 : vector<8x128xf32>
    %cst_42 = arith.constant 1.000000e+00 : f32
    %155 = vector.broadcast %cst_42 : f32 to vector<8x128xf32>
    %156 = arith.addf %155, %154 : vector<8x128xf32>
    %157 = arith.divf %155, %156 : vector<8x128xf32>
    %158 = vector.extract_strided_slice %157 {offsets = [0, 0], sizes = [8, 32], strides = [1, 1]} : vector<8x128xf32> to vector<8x32xf32>
    %159 = vector.extract_strided_slice %157 {offsets = [0, 32], sizes = [8, 32], strides = [1, 1]} : vector<8x128xf32> to vector<8x32xf32>
    %160 = vector.extract_strided_slice %157 {offsets = [0, 96], sizes = [8, 32], strides = [1, 1]} : vector<8x128xf32> to vector<8x32xf32>
    %161 = vector.extract_strided_slice %152 {offsets = [0, 64], sizes = [8, 32], strides = [1, 1]} : vector<8x128xf32> to vector<8x32xf32>
    %162 = math.tanh %161 : vector<8x32xf32>
    %163 = arith.mulf %159, %142 : vector<8x32xf32>
    %164 = arith.mulf %158, %162 : vector<8x32xf32>
    %165 = arith.addf %163, %164 : vector<8x32xf32>
    %166 = math.tanh %165 : vector<8x32xf32>
    %167 = arith.mulf %160, %166 : vector<8x32xf32>
    %168 = arith.index_cast %148 : i32 to index
    %c0_43 = arith.constant 0 : index
    %169 = vector.load %arg11[%168, %c0_43] : memref<64x32xf32, #tpu.memory_space<vmem>>, vector<8x32xf32>
    tpu.vector_store %arg11[%168, %c0_43], %167 {strides = array<i32>} : memref<64x32xf32, #tpu.memory_space<vmem>>, vector<8x32xf32>,
    %c7_i32 = arith.constant 7 : i32
    %c8_i32_44 = arith.constant 8 : i32
    %170 = arith.muli %c7_i32, %c8_i32_44 : i32
    %171 = tpu.assume_multiple %170, 8 : i32
    %172 = arith.index_cast %171 : i32 to index
    %c0_45 = arith.constant 0 : index
    %173 = vector.load %arg10[%172, %c0_45] : memref<64x128xf32, #tpu.memory_space<vmem>>, vector<8x128xf32>
    %cst_46 = arith.constant dense<0.000000e+00> : vector<8x128xf32>
    %174 = tpu.matmul %167, %2, %cst_46 {dimension_numbers = #tpu.dot_dimension_numbers<[1], [0], [0], [1], [0, 0, 1, 1], [], []>} : vector<8x32xf32>, vector<32x128xf32>, vector<8x128xf32> -> vector<8x128xf32>
    %175 = arith.addf %173, %174 : vector<8x128xf32>
    %176 = arith.negf %175 : vector<8x128xf32>
    %177 = math.exp %176 : vector<8x128xf32>
    %cst_47 = arith.constant 1.000000e+00 : f32
    %178 = vector.broadcast %cst_47 : f32 to vector<8x128xf32>
    %179 = arith.addf %178, %177 : vector<8x128xf32>
    %180 = arith.divf %178, %179 : vector<8x128xf32>
    %181 = vector.extract_strided_slice %180 {offsets = [0, 0], sizes = [8, 32], strides = [1, 1]} : vector<8x128xf32> to vector<8x32xf32>
    %182 = vector.extract_strided_slice %180 {offsets = [0, 32], sizes = [8, 32], strides = [1, 1]} : vector<8x128xf32> to vector<8x32xf32>
    %183 = vector.extract_strided_slice %180 {offsets = [0, 96], sizes = [8, 32], strides = [1, 1]} : vector<8x128xf32> to vector<8x32xf32>
    %184 = vector.extract_strided_slice %175 {offsets = [0, 64], sizes = [8, 32], strides = [1, 1]} : vector<8x128xf32> to vector<8x32xf32>
    %185 = math.tanh %184 : vector<8x32xf32>
    %186 = arith.mulf %182, %165 : vector<8x32xf32>
    %187 = arith.mulf %181, %185 : vector<8x32xf32>
    %188 = arith.addf %186, %187 : vector<8x32xf32>
    %189 = math.tanh %188 : vector<8x32xf32>
    %190 = arith.mulf %183, %189 : vector<8x32xf32>
    %191 = arith.index_cast %171 : i32 to index
    %c0_48 = arith.constant 0 : index
    %192 = vector.load %arg11[%191, %c0_48] : memref<64x32xf32, #tpu.memory_space<vmem>>, vector<8x32xf32>
    tpu.vector_store %arg11[%191, %c0_48], %190 {strides = array<i32>} : memref<64x32xf32, #tpu.memory_space<vmem>>, vector<8x32xf32>,
    %c8_i32_49 = arith.constant 8 : i32
    %c0_50 = arith.constant 0 : index
    %c0_51 = arith.constant 0 : index
    %193 = vector.load %arg11[%c0_50, %c0_51] : memref<64x32xf32, #tpu.memory_space<vmem>>, vector<64x32xf32>
    %c0_52 = arith.constant 0 : index
    %c0_53 = arith.constant 0 : index
    %194 = vector.load %arg4[%c0_52, %c0_53] : memref<32x128xf32, #tpu.memory_space<vmem>>, vector<32x128xf32>
    %c0_54 = arith.constant 0 : index
    %c0_55 = arith.constant 0 : index
    %195 = vector.load %arg5[%c0_54, %c0_55] : memref<32x128xf32, #tpu.memory_space<vmem>>, vector<32x128xf32>
    %c0_56 = arith.constant 0 : index
    %c0_57 = arith.constant 0 : index
    %196 = vector.load %arg6[%c0_56, %c0_57] : memref<1x128xf32, #tpu.memory_space<vmem>>, vector<1x128xf32>
    %cst_58 = arith.constant dense<0.000000e+00> : vector<64x128xf32>
    %197 = tpu.matmul %193, %194, %cst_58 {dimension_numbers = #tpu.dot_dimension_numbers<[1], [0], [0], [1], [0, 0, 1, 1], [], []>} : vector<64x32xf32>, vector<32x128xf32>, vector<64x128xf32> -> vector<64x128xf32>
    %198 = vector.broadcast %196 : vector<1x128xf32> to vector<64x128xf32>
    %199 = arith.addf %197, %198 : vector<64x128xf32>
    %c0_59 = arith.constant 0 : index
    %c0_60 = arith.constant 0 : index
    %200 = vector.load %arg10[%c0_59, %c0_60] : memref<64x128xf32, #tpu.memory_space<vmem>>, vector<64x128xf32>
    tpu.vector_store %arg10[%c0_59, %c0_60], %199 {strides = array<i32>} : memref<64x128xf32, #tpu.memory_space<vmem>>, vector<64x128xf32>,
    %cst_61 = arith.constant 0.000000e+00 : f32
    %201 = vector.broadcast %cst_61 : f32 to vector<8x32xf32>
    %c0_i32_62 = arith.constant 0 : i32
    %c8_i32_63 = arith.constant 8 : i32
    %202 = arith.muli %c0_i32_62, %c8_i32_63 : i32
    %203 = tpu.assume_multiple %202, 8 : i32
    %204 = arith.index_cast %203 : i32 to index
    %c0_64 = arith.constant 0 : index
    %205 = vector.load %arg10[%204, %c0_64] : memref<64x128xf32, #tpu.memory_space<vmem>>, vector<8x128xf32>
    %cst_65 = arith.constant dense<0.000000e+00> : vector<8x128xf32>
    %206 = tpu.matmul %201, %195, %cst_65 {dimension_numbers = #tpu.dot_dimension_numbers<[1], [0], [0], [1], [0, 0, 1, 1], [], []>} : vector<8x32xf32>, vector<32x128xf32>, vector<8x128xf32> -> vector<8x128xf32>
    %207 = arith.addf %205, %206 : vector<8x128xf32>
    %208 = arith.negf %207 : vector<8x128xf32>
    %209 = math.exp %208 : vector<8x128xf32>
    %cst_66 = arith.constant 1.000000e+00 : f32
    %210 = vector.broadcast %cst_66 : f32 to vector<8x128xf32>
    %211 = arith.addf %210, %209 : vector<8x128xf32>
    %212 = arith.divf %210, %211 : vector<8x128xf32>
    %213 = vector.extract_strided_slice %212 {offsets = [0, 0], sizes = [8, 32], strides = [1, 1]} : vector<8x128xf32> to vector<8x32xf32>
    %214 = vector.extract_strided_slice %212 {offsets = [0, 32], sizes = [8, 32], strides = [1, 1]} : vector<8x128xf32> to vector<8x32xf32>
    %215 = vector.extract_strided_slice %212 {offsets = [0, 96], sizes = [8, 32], strides = [1, 1]} : vector<8x128xf32> to vector<8x32xf32>
    %216 = vector.extract_strided_slice %207 {offsets = [0, 64], sizes = [8, 32], strides = [1, 1]} : vector<8x128xf32> to vector<8x32xf32>
    %217 = math.tanh %216 : vector<8x32xf32>
    %218 = arith.mulf %214, %201 : vector<8x32xf32>
    %219 = arith.mulf %213, %217 : vector<8x32xf32>
    %220 = arith.addf %218, %219 : vector<8x32xf32>
    %221 = math.tanh %220 : vector<8x32xf32>
    %222 = arith.mulf %215, %221 : vector<8x32xf32>
    %c1_i32_67 = arith.constant 1 : i32
    %c8_i32_68 = arith.constant 8 : i32
    %223 = arith.muli %c1_i32_67, %c8_i32_68 : i32
    %224 = tpu.assume_multiple %223, 8 : i32
    %225 = arith.index_cast %224 : i32 to index
    %c0_69 = arith.constant 0 : index
    %226 = vector.load %arg10[%225, %c0_69] : memref<64x128xf32, #tpu.memory_space<vmem>>, vector<8x128xf32>
    %cst_70 = arith.constant dense<0.000000e+00> : vector<8x128xf32>
    %227 = tpu.matmul %222, %195, %cst_70 {dimension_numbers = #tpu.dot_dimension_numbers<[1], [0], [0], [1], [0, 0, 1, 1], [], []>} : vector<8x32xf32>, vector<32x128xf32>, vector<8x128xf32> -> vector<8x128xf32>
    %228 = arith.addf %226, %227 : vector<8x128xf32>
    %229 = arith.negf %228 : vector<8x128xf32>
    %230 = math.exp %229 : vector<8x128xf32>
    %cst_71 = arith.constant 1.000000e+00 : f32
    %231 = vector.broadcast %cst_71 : f32 to vector<8x128xf32>
    %232 = arith.addf %231, %230 : vector<8x128xf32>
    %233 = arith.divf %231, %232 : vector<8x128xf32>
    %234 = vector.extract_strided_slice %233 {offsets = [0, 0], sizes = [8, 32], strides = [1, 1]} : vector<8x128xf32> to vector<8x32xf32>
    %235 = vector.extract_strided_slice %233 {offsets = [0, 32], sizes = [8, 32], strides = [1, 1]} : vector<8x128xf32> to vector<8x32xf32>
    %236 = vector.extract_strided_slice %233 {offsets = [0, 96], sizes = [8, 32], strides = [1, 1]} : vector<8x128xf32> to vector<8x32xf32>
    %237 = vector.extract_strided_slice %228 {offsets = [0, 64], sizes = [8, 32], strides = [1, 1]} : vector<8x128xf32> to vector<8x32xf32>
    %238 = math.tanh %237 : vector<8x32xf32>
    %239 = arith.mulf %235, %220 : vector<8x32xf32>
    %240 = arith.mulf %234, %238 : vector<8x32xf32>
    %241 = arith.addf %239, %240 : vector<8x32xf32>
    %242 = math.tanh %241 : vector<8x32xf32>
    %243 = arith.mulf %236, %242 : vector<8x32xf32>
    %c2_i32_72 = arith.constant 2 : i32
    %c8_i32_73 = arith.constant 8 : i32
    %244 = arith.muli %c2_i32_72, %c8_i32_73 : i32
    %245 = tpu.assume_multiple %244, 8 : i32
    %246 = arith.index_cast %245 : i32 to index
    %c0_74 = arith.constant 0 : index
    %247 = vector.load %arg10[%246, %c0_74] : memref<64x128xf32, #tpu.memory_space<vmem>>, vector<8x128xf32>
    %cst_75 = arith.constant dense<0.000000e+00> : vector<8x128xf32>
    %248 = tpu.matmul %243, %195, %cst_75 {dimension_numbers = #tpu.dot_dimension_numbers<[1], [0], [0], [1], [0, 0, 1, 1], [], []>} : vector<8x32xf32>, vector<32x128xf32>, vector<8x128xf32> -> vector<8x128xf32>
    %249 = arith.addf %247, %248 : vector<8x128xf32>
    %250 = arith.negf %249 : vector<8x128xf32>
    %251 = math.exp %250 : vector<8x128xf32>
    %cst_76 = arith.constant 1.000000e+00 : f32
    %252 = vector.broadcast %cst_76 : f32 to vector<8x128xf32>
    %253 = arith.addf %252, %251 : vector<8x128xf32>
    %254 = arith.divf %252, %253 : vector<8x128xf32>
    %255 = vector.extract_strided_slice %254 {offsets = [0, 0], sizes = [8, 32], strides = [1, 1]} : vector<8x128xf32> to vector<8x32xf32>
    %256 = vector.extract_strided_slice %254 {offsets = [0, 32], sizes = [8, 32], strides = [1, 1]} : vector<8x128xf32> to vector<8x32xf32>
    %257 = vector.extract_strided_slice %254 {offsets = [0, 96], sizes = [8, 32], strides = [1, 1]} : vector<8x128xf32> to vector<8x32xf32>
    %258 = vector.extract_strided_slice %249 {offsets = [0, 64], sizes = [8, 32], strides = [1, 1]} : vector<8x128xf32> to vector<8x32xf32>
    %259 = math.tanh %258 : vector<8x32xf32>
    %260 = arith.mulf %256, %241 : vector<8x32xf32>
    %261 = arith.mulf %255, %259 : vector<8x32xf32>
    %262 = arith.addf %260, %261 : vector<8x32xf32>
    %263 = math.tanh %262 : vector<8x32xf32>
    %264 = arith.mulf %257, %263 : vector<8x32xf32>
    %c3_i32_77 = arith.constant 3 : i32
    %c8_i32_78 = arith.constant 8 : i32
    %265 = arith.muli %c3_i32_77, %c8_i32_78 : i32
    %266 = tpu.assume_multiple %265, 8 : i32
    %267 = arith.index_cast %266 : i32 to index
    %c0_79 = arith.constant 0 : index
    %268 = vector.load %arg10[%267, %c0_79] : memref<64x128xf32, #tpu.memory_space<vmem>>, vector<8x128xf32>
    %cst_80 = arith.constant dense<0.000000e+00> : vector<8x128xf32>
    %269 = tpu.matmul %264, %195, %cst_80 {dimension_numbers = #tpu.dot_dimension_numbers<[1], [0], [0], [1], [0, 0, 1, 1], [], []>} : vector<8x32xf32>, vector<32x128xf32>, vector<8x128xf32> -> vector<8x128xf32>
    %270 = arith.addf %268, %269 : vector<8x128xf32>
    %271 = arith.negf %270 : vector<8x128xf32>
    %272 = math.exp %271 : vector<8x128xf32>
    %cst_81 = arith.constant 1.000000e+00 : f32
    %273 = vector.broadcast %cst_81 : f32 to vector<8x128xf32>
    %274 = arith.addf %273, %272 : vector<8x128xf32>
    %275 = arith.divf %273, %274 : vector<8x128xf32>
    %276 = vector.extract_strided_slice %275 {offsets = [0, 0], sizes = [8, 32], strides = [1, 1]} : vector<8x128xf32> to vector<8x32xf32>
    %277 = vector.extract_strided_slice %275 {offsets = [0, 32], sizes = [8, 32], strides = [1, 1]} : vector<8x128xf32> to vector<8x32xf32>
    %278 = vector.extract_strided_slice %275 {offsets = [0, 96], sizes = [8, 32], strides = [1, 1]} : vector<8x128xf32> to vector<8x32xf32>
    %279 = vector.extract_strided_slice %270 {offsets = [0, 64], sizes = [8, 32], strides = [1, 1]} : vector<8x128xf32> to vector<8x32xf32>
    %280 = math.tanh %279 : vector<8x32xf32>
    %281 = arith.mulf %277, %262 : vector<8x32xf32>
    %282 = arith.mulf %276, %280 : vector<8x32xf32>
    %283 = arith.addf %281, %282 : vector<8x32xf32>
    %284 = math.tanh %283 : vector<8x32xf32>
    %285 = arith.mulf %278, %284 : vector<8x32xf32>
    %c4_i32_82 = arith.constant 4 : i32
    %c8_i32_83 = arith.constant 8 : i32
    %286 = arith.muli %c4_i32_82, %c8_i32_83 : i32
    %287 = tpu.assume_multiple %286, 8 : i32
    %288 = arith.index_cast %287 : i32 to index
    %c0_84 = arith.constant 0 : index
    %289 = vector.load %arg10[%288, %c0_84] : memref<64x128xf32, #tpu.memory_space<vmem>>, vector<8x128xf32>
    %cst_85 = arith.constant dense<0.000000e+00> : vector<8x128xf32>
    %290 = tpu.matmul %285, %195, %cst_85 {dimension_numbers = #tpu.dot_dimension_numbers<[1], [0], [0], [1], [0, 0, 1, 1], [], []>} : vector<8x32xf32>, vector<32x128xf32>, vector<8x128xf32> -> vector<8x128xf32>
    %291 = arith.addf %289, %290 : vector<8x128xf32>
    %292 = arith.negf %291 : vector<8x128xf32>
    %293 = math.exp %292 : vector<8x128xf32>
    %cst_86 = arith.constant 1.000000e+00 : f32
    %294 = vector.broadcast %cst_86 : f32 to vector<8x128xf32>
    %295 = arith.addf %294, %293 : vector<8x128xf32>
    %296 = arith.divf %294, %295 : vector<8x128xf32>
    %297 = vector.extract_strided_slice %296 {offsets = [0, 0], sizes = [8, 32], strides = [1, 1]} : vector<8x128xf32> to vector<8x32xf32>
    %298 = vector.extract_strided_slice %296 {offsets = [0, 32], sizes = [8, 32], strides = [1, 1]} : vector<8x128xf32> to vector<8x32xf32>
    %299 = vector.extract_strided_slice %296 {offsets = [0, 96], sizes = [8, 32], strides = [1, 1]} : vector<8x128xf32> to vector<8x32xf32>
    %300 = vector.extract_strided_slice %291 {offsets = [0, 64], sizes = [8, 32], strides = [1, 1]} : vector<8x128xf32> to vector<8x32xf32>
    %301 = math.tanh %300 : vector<8x32xf32>
    %302 = arith.mulf %298, %283 : vector<8x32xf32>
    %303 = arith.mulf %297, %301 : vector<8x32xf32>
    %304 = arith.addf %302, %303 : vector<8x32xf32>
    %305 = math.tanh %304 : vector<8x32xf32>
    %306 = arith.mulf %299, %305 : vector<8x32xf32>
    %c5_i32_87 = arith.constant 5 : i32
    %c8_i32_88 = arith.constant 8 : i32
    %307 = arith.muli %c5_i32_87, %c8_i32_88 : i32
    %308 = tpu.assume_multiple %307, 8 : i32
    %309 = arith.index_cast %308 : i32 to index
    %c0_89 = arith.constant 0 : index
    %310 = vector.load %arg10[%309, %c0_89] : memref<64x128xf32, #tpu.memory_space<vmem>>, vector<8x128xf32>
    %cst_90 = arith.constant dense<0.000000e+00> : vector<8x128xf32>
    %311 = tpu.matmul %306, %195, %cst_90 {dimension_numbers = #tpu.dot_dimension_numbers<[1], [0], [0], [1], [0, 0, 1, 1], [], []>} : vector<8x32xf32>, vector<32x128xf32>, vector<8x128xf32> -> vector<8x128xf32>
    %312 = arith.addf %310, %311 : vector<8x128xf32>
    %313 = arith.negf %312 : vector<8x128xf32>
    %314 = math.exp %313 : vector<8x128xf32>
    %cst_91 = arith.constant 1.000000e+00 : f32
    %315 = vector.broadcast %cst_91 : f32 to vector<8x128xf32>
    %316 = arith.addf %315, %314 : vector<8x128xf32>
    %317 = arith.divf %315, %316 : vector<8x128xf32>
    %318 = vector.extract_strided_slice %317 {offsets = [0, 0], sizes = [8, 32], strides = [1, 1]} : vector<8x128xf32> to vector<8x32xf32>
    %319 = vector.extract_strided_slice %317 {offsets = [0, 32], sizes = [8, 32], strides = [1, 1]} : vector<8x128xf32> to vector<8x32xf32>
    %320 = vector.extract_strided_slice %317 {offsets = [0, 96], sizes = [8, 32], strides = [1, 1]} : vector<8x128xf32> to vector<8x32xf32>
    %321 = vector.extract_strided_slice %312 {offsets = [0, 64], sizes = [8, 32], strides = [1, 1]} : vector<8x128xf32> to vector<8x32xf32>
    %322 = math.tanh %321 : vector<8x32xf32>
    %323 = arith.mulf %319, %304 : vector<8x32xf32>
    %324 = arith.mulf %318, %322 : vector<8x32xf32>
    %325 = arith.addf %323, %324 : vector<8x32xf32>
    %326 = math.tanh %325 : vector<8x32xf32>
    %327 = arith.mulf %320, %326 : vector<8x32xf32>
    %c6_i32_92 = arith.constant 6 : i32
    %c8_i32_93 = arith.constant 8 : i32
    %328 = arith.muli %c6_i32_92, %c8_i32_93 : i32
    %329 = tpu.assume_multiple %328, 8 : i32
    %330 = arith.index_cast %329 : i32 to index
    %c0_94 = arith.constant 0 : index
    %331 = vector.load %arg10[%330, %c0_94] : memref<64x128xf32, #tpu.memory_space<vmem>>, vector<8x128xf32>
    %cst_95 = arith.constant dense<0.000000e+00> : vector<8x128xf32>
    %332 = tpu.matmul %327, %195, %cst_95 {dimension_numbers = #tpu.dot_dimension_numbers<[1], [0], [0], [1], [0, 0, 1, 1], [], []>} : vector<8x32xf32>, vector<32x128xf32>, vector<8x128xf32> -> vector<8x128xf32>
    %333 = arith.addf %331, %332 : vector<8x128xf32>
    %334 = arith.negf %333 : vector<8x128xf32>
    %335 = math.exp %334 : vector<8x128xf32>
    %cst_96 = arith.constant 1.000000e+00 : f32
    %336 = vector.broadcast %cst_96 : f32 to vector<8x128xf32>
    %337 = arith.addf %336, %335 : vector<8x128xf32>
    %338 = arith.divf %336, %337 : vector<8x128xf32>
    %339 = vector.extract_strided_slice %338 {offsets = [0, 0], sizes = [8, 32], strides = [1, 1]} : vector<8x128xf32> to vector<8x32xf32>
    %340 = vector.extract_strided_slice %338 {offsets = [0, 32], sizes = [8, 32], strides = [1, 1]} : vector<8x128xf32> to vector<8x32xf32>
    %341 = vector.extract_strided_slice %338 {offsets = [0, 96], sizes = [8, 32], strides = [1, 1]} : vector<8x128xf32> to vector<8x32xf32>
    %342 = vector.extract_strided_slice %333 {offsets = [0, 64], sizes = [8, 32], strides = [1, 1]} : vector<8x128xf32> to vector<8x32xf32>
    %343 = math.tanh %342 : vector<8x32xf32>
    %344 = arith.mulf %340, %325 : vector<8x32xf32>
    %345 = arith.mulf %339, %343 : vector<8x32xf32>
    %346 = arith.addf %344, %345 : vector<8x32xf32>
    %347 = math.tanh %346 : vector<8x32xf32>
    %348 = arith.mulf %341, %347 : vector<8x32xf32>
    %c7_i32_97 = arith.constant 7 : i32
    %c8_i32_98 = arith.constant 8 : i32
    %349 = arith.muli %c7_i32_97, %c8_i32_98 : i32
    %350 = tpu.assume_multiple %349, 8 : i32
    %351 = arith.index_cast %350 : i32 to index
    %c0_99 = arith.constant 0 : index
    %352 = vector.load %arg10[%351, %c0_99] : memref<64x128xf32, #tpu.memory_space<vmem>>, vector<8x128xf32>
    %cst_100 = arith.constant dense<0.000000e+00> : vector<8x128xf32>
    %353 = tpu.matmul %348, %195, %cst_100 {dimension_numbers = #tpu.dot_dimension_numbers<[1], [0], [0], [1], [0, 0, 1, 1], [], []>} : vector<8x32xf32>, vector<32x128xf32>, vector<8x128xf32> -> vector<8x128xf32>
    %354 = arith.addf %352, %353 : vector<8x128xf32>
    %355 = arith.negf %354 : vector<8x128xf32>
    %356 = math.exp %355 : vector<8x128xf32>
    %cst_101 = arith.constant 1.000000e+00 : f32
    %357 = vector.broadcast %cst_101 : f32 to vector<8x128xf32>
    %358 = arith.addf %357, %356 : vector<8x128xf32>
    %359 = arith.divf %357, %358 : vector<8x128xf32>
    %360 = vector.extract_strided_slice %359 {offsets = [0, 0], sizes = [8, 32], strides = [1, 1]} : vector<8x128xf32> to vector<8x32xf32>
    %361 = vector.extract_strided_slice %359 {offsets = [0, 32], sizes = [8, 32], strides = [1, 1]} : vector<8x128xf32> to vector<8x32xf32>
    %362 = vector.extract_strided_slice %359 {offsets = [0, 96], sizes = [8, 32], strides = [1, 1]} : vector<8x128xf32> to vector<8x32xf32>
    %363 = vector.extract_strided_slice %354 {offsets = [0, 64], sizes = [8, 32], strides = [1, 1]} : vector<8x128xf32> to vector<8x32xf32>
    %364 = math.tanh %363 : vector<8x32xf32>
    %365 = arith.mulf %361, %346 : vector<8x32xf32>
    %366 = arith.mulf %360, %364 : vector<8x32xf32>
    %367 = arith.addf %365, %366 : vector<8x32xf32>
    %368 = math.tanh %367 : vector<8x32xf32>
    %369 = arith.mulf %362, %368 : vector<8x32xf32>
    %c8_i32_102 = arith.constant 8 : i32
    %c0_103 = arith.constant 0 : index
    %c0_104 = arith.constant 0 : index
    %370 = vector.load %arg7[%c0_103, %c0_104] : memref<32x128xf32, #tpu.memory_space<vmem>>, vector<32x128xf32>
    %cst_105 = arith.constant dense<0.000000e+00> : vector<8x128xf32>
    %371 = tpu.matmul %369, %370, %cst_105 {dimension_numbers = #tpu.dot_dimension_numbers<[1], [0], [0], [1], [0, 0, 1, 1], [], []>} : vector<8x32xf32>, vector<32x128xf32>, vector<8x128xf32> -> vector<8x128xf32>
    %c0_106 = arith.constant 0 : index
    %c0_107 = arith.constant 0 : index
    %372 = vector.load %arg8[%c0_106, %c0_107] : memref<1x128xf32, #tpu.memory_space<vmem>>, vector<1x128xf32>
    %373 = vector.broadcast %372 : vector<1x128xf32> to vector<8x128xf32>
    %374 = arith.addf %371, %373 : vector<8x128xf32>
    %c0_108 = arith.constant 0 : index
    %c0_109 = arith.constant 0 : index
    %375 = vector.load %arg9[%c0_108, %c0_109] : memref<8x128xf32, #tpu.memory_space<vmem>>, vector<8x128xf32>
    tpu.vector_store %arg9[%c0_108, %c0_109], %374 {strides = array<i32>} : memref<8x128xf32, #tpu.memory_space<vmem>>, vector<8x128xf32>,
    return
  }
}

</mosaic_0001>

<bundles_post_ra>
// kernel: physi_lstm_forward.1
= control target key start
LH: loop header
LB: loop body
LE: loop exit
PB: predicated region body
PF: predicated region fallthrough
CT: control target
= control target key end

     0   :  { %14 = vsyncpa [#allocation6], 0  ;;  %s3155_s0 = inlined_call_operand.vmem [shape: f32[64,128], index: 0, kind: input, shape index: {}]   ;;  %s3156_s1 = inlined_call_operand.hbm [shape: f32[128,128], index: 1, kind: input, shape index: {}]   ;;  %s3157_s2 = inlined_call_operand.vmem [shape: f32[32,128], index: 2, kind: input, shape index: {}]   ;;  %s3158_s3 = inlined_call_operand.vmem [shape: f32[1,128], index: 3, kind: input, shape index: {}]   ;;  %s3159_s4 = inlined_call_operand.vmem [shape: f32[32,128], index: 4, kind: input, shape index: {}]   ;;  %s3160_s5 = inlined_call_operand.vmem [shape: f32[32,128], index: 5, kind: input, shape index: {}]   ;;  %s3161_s6 = inlined_call_operand.vmem [shape: f32[1,128], index: 6, kind: input, shape index: {}]   ;;  %s3162_s7 = inlined_call_operand.hbm [shape: f32[32,128], index: 7, kind: input, shape index: {}]   ;;  %s3163_s8 = inlined_call_operand.vmem [shape: f32[1,128], index: 8, kind: input, shape index: {}]   ;;  %s3164_s9 = inlined_call_operand.vmem [shape: f32[8,128], index: 9, kind: output, shape index: {}]  }
   0x1   :  { %15 = vsyncpa [#allocation8], 0  ;;  %s2698_s30 = smov [#allocation5]  }
   0x2   :  { %s23_s10 = sshll.u32 %s2698_s30, 4  ;;  %s24_s10 = int_to_ptr.vmem [resolvable:$true] %s23_s10 }
   0x3   :  { %s2662_s11 = scalar_lea.vmem %s24_s10, 2048  ;;  %p2667_p1 = scmp.lt.s32.totalorder %s24_s10, %s24_s10 }
   0x4   :  { %p2663_p0 = scmp.ne.s32.totalorder %s24_s10, %s2662_s11  ;;  %p2668_p2 = scmp.lt.s32.totalorder %s2662_s11, %s2662_s11 }
   0x6   :  { %p2669_p3 = por %p2668_p2, %p2667_p1 }
   0x8   :  { %p2670_p4 = pnand %p2669_p3, %p2663_p0 }
   0xa   :  { %2673 = shalt.err (!%p2670_p4)
}
   0xb   :  { %s2699_s12 = smov 128   ;;  %s2700_s13 = smov 8  }
   0xc   :  { %29 = dma.hbm_to_vmem [thread:$0]  %s3156_s1, 2048, %s24_s10, [#allocation6], %s2699_s12, %s2699_s12, %s2700_s13  }
   0xd   :  { %s2701_s16 = smov [#allocation7]  }
   0xe   :  { %s45_s17 = sshll.u32 %s2701_s16, 4  ;;  %s46_s17 = int_to_ptr.vmem [resolvable:$true] %s45_s17 }
   0xf   :  { %s2682_s18 = scalar_lea.vmem %s46_s17, 512  ;;  %p2687_p6 = scmp.lt.s32.totalorder %s46_s17, %s46_s17 }
  0x10   :  { %p2683_p5 = scmp.ne.s32.totalorder %s46_s17, %s2682_s18  ;;  %p2688_p7 = scmp.lt.s32.totalorder %s2682_s18, %s2682_s18 }
  0x12   :  { %p2689_p8 = por %p2688_p7, %p2687_p6 }
  0x14   :  { %p2690_p9 = pnand %p2689_p8, %p2683_p5 }
  0x16   :  { %2693 = shalt.err (!%p2690_p9)
}
  0x17   :  { %51 = dma.hbm_to_vmem [thread:$0]  %s3162_s7, 512, %s46_s17, [#allocation8], %s2699_s12, %s2699_s12, %s2700_s13  }
  0x18   :  { %2694 = dma.done.wait [#allocation6], 2048  }
  0x19   :  { %2695 = vsyncadd [#allocation6], 4294965248 }
  0x1a   :  { %2696 = dma.done.wait [#allocation8], 512  }
  0x1b   :  { %2697 = vsyncadd [#allocation8], 4294966784  ;;  %v2702_v0 = vmov 0.0   ;;  %vm2703_vm0 = vmmov 0   ;;  %v83_v1 = vld [vmem:[#allocation5 + $0x78] sm:$0xff]  ;;  %v82_v2 = vld [vmem:[#allocation5 + $0x70] sm:$0xff] }
  0x1c   :  { %2311 = vmatprep.subr.mxu1 %v2702_v0  ;;  %2319 = vmatprep.mubr.msk.f32.mxu1 %vm2703_vm0, %v2702_v0  ;;  %v81_v3 = vld [vmem:[#allocation5 + $0x68] sm:$0xff]  ;;  %v80_v4 = vld [vmem:[#allocation5 + $0x60] sm:$0xff]  ;;  %v2768_v5 = vld [vmem:[%s3157_s2 + $0x18] sm:$0xff]  ;;  %s2704_s11 = smov 64   ;;  %s2705_s12 = smov 32   ;;  %vm209_vm1 = vcmask 261120  }
  0x1d   :  { %2267 = vmatprep.subr.mxu0 %v83_v1  ;;  %2312 = vmatpush3.msra.mxu1 %v2768_v5  ;;  %v2774_v6 = vld [vmem:[%s3157_s2 + $0x10] sm:$0xff]  ;;  %v79_v7 = vld [vmem:[#allocation5 + $0x58] sm:$0xff]  ;;  %v60_v8 = vld [vmem:[%s3155_s0] sm:$0xff] }
  0x1e   :  { %2268 = vmatpush3.msra.mxu0 %v83_v1  ;;  %2313 = vmatprep.subr.mxu1 %v2702_v0  ;;  %v2784_v9 = vld [vmem:[%s3157_s2 + $0x8] sm:$0xff]  ;;  %v78_v10 = vld [vmem:[#allocation5 + $0x50] sm:$0xff]  ;;  %v2790_v11 = vld [vmem:[%s3157_s2] sm:$0xff] }
  0x1f   :  { %2269 = vmatprep.subr.mxu0 %v82_v2  ;;  %2314 = vmatpush3.msra.mxu1 %v2774_v6  ;;  %v77_v12 = vld [vmem:[#allocation5 + $0x48] sm:$0xff]  ;;  %v76_v13 = vld [vmem:[#allocation5 + $0x40] sm:$0xff]  ;;  %v75_v14 = vld [vmem:[#allocation5 + $0x38] sm:$0xff] }
  0x20   :  { %2270 = vmatpush3.msra.mxu0 %v82_v2  ;;  %2315 = vmatprep.subr.mxu1 %v2702_v0  ;;  %v74_v15 = vld [vmem:[#allocation5 + $0x30] sm:$0xff]  ;;  %v73_v16 = vld [vmem:[#allocation5 + $0x28] sm:$0xff]  ;;  %v72_v17 = vld [vmem:[#allocation5 + $0x20] sm:$0xff] }
  0x21   :  { %2271 = vmatprep.subr.mxu0 %v81_v3  ;;  %2299 = vmatprep.mubr.f32.mxu0 %v60_v8  ;;  %v71_v18 = vld [vmem:[#allocation5 + $0x18] sm:$0xff]  ;;  %v70_v19 = vld [vmem:[#allocation5 + $0x10] sm:$0xff]  ;;  %v69_v20 = vld [vmem:[#allocation5 + $0x8] sm:$0xff] }
  0x22   :  { %2272 = vmatpush3.msra.mxu0 %v81_v3  ;;  %2316 = vmatpush3.msra.mxu1 %v2784_v9  ;;  %v68_v21 = vld [vmem:[#allocation5] sm:$0xff]  ;;  %v61_v22 = vld [vmem:[%s3155_s0 + $0x8] sm:$0xff]  ;;  %v62_v58 = vld [vmem:[%s3155_s0 + $0x10] sm:$0xff] }
  0x23   :  { %2273 = vmatprep.subr.mxu0 %v80_v4  ;;  %2317 = vmatprep.subr.mxu1 %v2702_v0  ;;  %v2822_v26 = vld [vmem:[%s3158_s3] ss:$0 sm:$0xff]  ;;  %v63_v59 = vld [vmem:[%s3155_s0 + $0x18] sm:$0xff] }
  0x24   :  { %2274 = vmatpush3.msra.mxu0 %v80_v4  ;;  %2318 = vmatpush3.msra.mxu1 %v2790_v11 }
  0x25   :  { %2275 = vmatprep.subr.mxu0 %v79_v7  ;;  %2320 = vmatmul.mubr.f32.vlgmr.msra.gmra.mxu1 %v2702_v0 }
  0x26   :  { %2276 = vmatpush3.msra.mxu0 %v79_v7  ;;  %2322 = vmatprep.subr.mxu1 %v2702_v0 }
  0x27   :  { %2277 = vmatprep.subr.mxu0 %v78_v10  ;;  %2323 = vmatpush3.msra.mxu1 %v2768_v5 }
  0x28   :  { %2278 = vmatpush3.msra.mxu0 %v78_v10  ;;  %2324 = vmatprep.subr.mxu1 %v2702_v0 }
  0x29   :  { %2279 = vmatprep.subr.mxu0 %v77_v12  ;;  %2325 = vmatpush3.msra.mxu1 %v2774_v6 }
  0x2a   :  { %2280 = vmatpush3.msra.mxu0 %v77_v12  ;;  %2326 = vmatprep.subr.mxu1 %v2702_v0 }
  0x2b   :  { %2281 = vmatprep.subr.mxu0 %v76_v13  ;;  %2327 = vmatpush3.msra.mxu1 %v2784_v9 }
  0x2c   :  { %2282 = vmatpush3.msra.mxu0 %v76_v13  ;;  %2328 = vmatprep.subr.mxu1 %v2702_v0 }
  0x2d   :  { %2283 = vmatprep.subr.mxu0 %v75_v14  ;;  %2329 = vmatpush3.msra.mxu1 %v2790_v11 }
  0x2e   :  { %2284 = vmatpush3.msra.mxu0 %v75_v14  ;;  %2330 = vmatprep.mubr.msk.f32.mxu1 %vm2703_vm0, %v2702_v0 }
  0x2f   :  { %2285 = vmatprep.subr.mxu0 %v74_v15  ;;  %2333 = vmatprep.subr.mxu1 %v2702_v0 }
  0x30   :  { %2286 = vmatpush3.msra.mxu0 %v74_v15 }
  0x31   :  { %2287 = vmatprep.subr.mxu0 %v73_v16 }
  0x32   :  { %2288 = vmatpush3.msra.mxu0 %v73_v16 }
  0x33   :  { %2289 = vmatprep.subr.mxu0 %v72_v17 }
  0x34   :  { %2290 = vmatpush3.msra.mxu0 %v72_v17 }
  0x35   :  { %2291 = vmatprep.subr.mxu0 %v71_v18 }
  0x36   :  { %2292 = vmatpush3.msra.mxu0 %v71_v18 }
  0x37   :  { %2293 = vmatprep.subr.mxu0 %v70_v19 }
  0x38   :  { %2294 = vmatpush3.msra.mxu0 %v70_v19 }
  0x39   :  { %2295 = vmatprep.subr.mxu0 %v69_v20 }
  0x3a   :  { %2296 = vmatpush3.msra.mxu0 %v69_v20 }
  0x3b   :  { %2297 = vmatprep.subr.mxu0 %v68_v21 }
  0x3c   :  { %2298 = vmatpush3.msra.mxu0 %v68_v21 }
  0x3d   :  { %2300 = vmatmul.mubr.f32.vlgmr.msra.gmra.mxu0 %v61_v22  ;;  %2366 = vmatprep.subr.mxu0 %v2702_v0 }
  0x3e   :  { %2367 = vmatpush3.msra.mxu0 %v2768_v5  ;;  %2302 = vmatprep.mubr.f32.mxu0 %v62_v58 }
  0x3f   :  { %2368 = vmatprep.subr.mxu0 %v2702_v0 }
  0x40   :  { %2369 = vmatpush3.msra.mxu0 %v2774_v6 }
  0x41   :  { %2370 = vmatprep.subr.mxu0 %v2702_v0  ;;  %2303 = vmatmul.mubr.f32.gmra.mxu0 %v63_v59 }
  0x42   :  { %2371 = vmatpush3.msra.mxu0 %v2784_v9 }
  0x43   :  { %2372 = vmatprep.subr.mxu0 %v2702_v0 }
  0x44   :  { %2373 = vmatpush3.msra.mxu0 %v2790_v11 }
  0x45   :  { %2388 = vmatprep.subr.mxu0 %v2702_v0 }
  0xe5   :  { %v279_v23 = vpop.f32.mrf.mxu1 }
  0xe7   :  { %v2321_v24 = vpop.f32.mrf.mxu1 }
  0xfd   :  { %v2301_v25 = vpop.f32.mrf.mxu0 }
  0xfe   :  { %v167_v44 = vadd.f32 %v2301_v25, %v2822_v26 }
  0xff   :  { %v161_v27 = vpop.f32.mrf.mxu0 }
 0x100   :  { %v162_v28 = vadd.f32 %v2822_v26, %v161_v27 }
 0x101   :  { %v2304_v1 = vpop.f32.mrf.mxu0 }
 0x102   :  { %v283_v29 = vadd.f32 %v279_v23, %v162_v28  ;;  %v177_v25 = vadd.f32 %v2304_v1, %v2822_v26 }
 0x103   :  { %v171_v2 = vpop.f32.mrf.mxu0 }
 0x104   :  { %2526 = vtanh.f32 %v283_v29  ;;  %v2105_v31 = vmul.f32 -1.442695, %v283_v29  ;;  %v172_v3 = vadd.f32 %v2822_v26, %v171_v2 }
 0x106   :  { %2528 = vpow2.f32 %v2105_v31 }
 0x111   :  { %v2527_v30 = vpop.eup %2526 }
 0x112   :  { %293 = vrot.lane.b32.xlu0 %v2527_v30, %s2704_s11 }
 0x113   :  { %v2529_v32 = vpop.eup %2528 }
 0x114   :  { %v287_v33 = vadd.f32 1.0, %v2529_v32 }
 0x116   :  { %2530 = vrcp.f32 %v287_v33 }
 0x123   :  { %v2531_v34 = vpop.eup %2530 }
 0x124   :  { %v291_v37 = vmul.f32 0.0, %v2531_v34 }
 0x184   :  { %v294_v35 = vpop.permute.xlu0 %293 }
 0x185   :  { %v296_v36 = vmul.f32 %v2531_v34, %v294_v35 }
 0x187   :  { %298 = vrot.lane.b32.xlu0 %v296_v36, %s2705_s12 }
 0x1f9   :  { %v299_v38 = vpop.permute.xlu0 %298 }
 0x1fa   :  { %v301_v39 = vadd.f32 %v299_v38, %v291_v37 }
 0x1fc   :  { %2532 = vtanh.f32 %v301_v39 }
 0x209   :  { %v2533_v40 = vpop.eup %2532 }
 0x20a   :  { %304 = vrot.lane.b32.xlu1 %v2533_v40, %s2704_s11  ;;  %v64_v40 = vld [vmem:[%s3155_s0 + $0x20] sm:$0xff] }
 0x20b   :  { %2305 = vmatprep.mubr.f32.mxu0 %v64_v40 }
 0x27c   :  { %v305_v41 = vpop.permute.xlu1 %304 }
 0x27d   :  { %v307_v42 = vmul.f32 %v2531_v34, %v305_v41  ;;  %v65_v41 = vld [vmem:[%s3155_s0 + $0x28] sm:$0xff] }
 0x27e   :  { %2306 = vmatmul.mubr.f32.gmra.mxu0 %v65_v41 }
 0x27f   :  { %309 = vrot.lane.b32.xlu1 %v307_v42, %s2705_s12 }
 0x2f1   :  { %v310_v43 = vpop.permute.xlu1 %309 }
 0x2f2   :  { %312 = vst.msk [vmem:[#allocation3] sm:$0xff] %vm209_vm1, %v310_v43  ;;  %2331 = vmatmul.mubr.msk.f32.vlgmr.msra.gmra.mxu1 %vm209_vm1, %v310_v43 }
 0x2f3   :  { %2334 = vmatpush3.msra.mxu1 %v2768_v5  ;;  %2341 = vmatprep.mubr.msk.f32.mxu1 %vm2703_vm0, %v2702_v0 }
 0x2f4   :  { %2335 = vmatprep.subr.mxu1 %v2702_v0 }
 0x2f5   :  { %2336 = vmatpush3.msra.mxu1 %v2774_v6 }
 0x2f6   :  { %2337 = vmatprep.subr.mxu1 %v2702_v0 }
 0x2f7   :  { %2338 = vmatpush3.msra.mxu1 %v2784_v9 }
 0x2f8   :  { %2339 = vmatprep.subr.mxu1 %v2702_v0 }
 0x2f9   :  { %2340 = vmatpush3.msra.mxu1 %v2790_v11 }
 0x2fa   :  { %2344 = vmatprep.subr.mxu1 %v2702_v0 }
 0x3b2   :  { %v383_v45 = vpop.f32.mrf.mxu1 }
 0x3b3   :  { %v387_v46 = vadd.f32 %v383_v45, %v167_v44 }
 0x3b4   :  { %v2332_v47 = vpop.f32.mrf.mxu1 }
 0x3b5   :  { %2534 = vtanh.f32 %v387_v46  ;;  %v2107_v49 = vmul.f32 -1.442695, %v387_v46  ;;  %v2307_v46 = vpop.f32.mrf.mxu0 }
 0x3b7   :  { %2536 = vpow2.f32 %v2107_v49  ;;  %v181_v47 = vpop.f32.mrf.mxu0 }
 0x3c2   :  { %v2535_v48 = vpop.eup %2534 }
 0x3c3   :  { %397 = vrot.lane.b32.xlu0 %v2535_v48, %s2704_s11  ;;  %v182_v48 = vadd.f32 %v2822_v26, %v181_v47 }
 0x3c4   :  { %v2537_v50 = vpop.eup %2536 }
 0x3c5   :  { %v391_v51 = vadd.f32 1.0, %v2537_v50 }
 0x3c7   :  { %2538 = vrcp.f32 %v391_v51 }
 0x3d4   :  { %v2539_v52 = vpop.eup %2538 }
 0x3d5   :  { %v395_v55 = vmul.f32 %v2539_v52, %v301_v39 }
 0x435   :  { %v398_v53 = vpop.permute.xlu0 %397 }
 0x436   :  { %v400_v54 = vmul.f32 %v2539_v52, %v398_v53 }
 0x438   :  { %402 = vrot.lane.b32.xlu1 %v400_v54, %s2705_s12 }
 0x4aa   :  { %v403_v56 = vpop.permute.xlu1 %402 }
 0x4ab   :  { %v405_v57 = vadd.f32 %v403_v56, %v395_v55 }
 0x4ad   :  { %2540 = vtanh.f32 %v405_v57 }
 0x4ba   :  { %v2541_v60 = vpop.eup %2540 }
 0x4bb   :  { %408 = vrot.lane.b32.xlu0 %v2541_v60, %s2704_s11 }
 0x52d   :  { %v409_v61 = vpop.permute.xlu0 %408 }
 0x52e   :  { %v411_v62 = vmul.f32 %v2539_v52, %v409_v61 }
 0x530   :  { %413 = vrot.lane.b32.xlu1 %v411_v62, %s2705_s12  ;;  %v66_v62 = vld [vmem:[%s3155_s0 + $0x30] sm:$0xff] }
 0x531   :  { %2308 = vmatprep.mubr.f32.mxu0 %v66_v62 }
 0x5a2   :  { %v414_v63 = vpop.permute.xlu1 %413 }
 0x5a3   :  { %417 = vst.msk [vmem:[#allocation3 + $0x8] sm:$0xff] %vm209_vm1, %v414_v63  ;;  %2342 = vmatmul.mubr.msk.f32.vlgmr.msra.gmra.mxu1 %vm209_vm1, %v414_v63  ;;  %v67_v63 = vld [vmem:[%s3155_s0 + $0x38] sm:$0xff] }
 0x5a4   :  { %2345 = vmatpush3.msra.mxu1 %v2768_v5  ;;  %2352 = vmatprep.mubr.msk.f32.mxu1 %vm2703_vm0, %v2702_v0 }
 0x5a5   :  { %2346 = vmatprep.subr.mxu1 %v2702_v0  ;;  %2309 = vmatmul.mubr.f32.gmra.mxu0 %v67_v63 }
 0x5a6   :  { %2347 = vmatpush3.msra.mxu1 %v2774_v6  ;;  %2374 = vmatprep.mubr.msk.f32.mxu0 %vm2703_vm0, %v2702_v0 }
 0x5a7   :  { %2348 = vmatprep.subr.mxu1 %v2702_v0 }
 0x5a8   :  { %2349 = vmatpush3.msra.mxu1 %v2784_v9 }
 0x5a9   :  { %2350 = vmatprep.subr.mxu1 %v2702_v0 }
 0x5aa   :  { %2351 = vmatpush3.msra.mxu1 %v2790_v11 }
 0x5ab   :  { %2355 = vmatprep.subr.mxu1 %v2702_v0 }
 0x663   :  { %v488_v4 = vpop.f32.mrf.mxu1 }
 0x664   :  { %v492_v7 = vadd.f32 %v488_v4, %v172_v3 }
 0x665   :  { %v2343_v8 = vpop.f32.mrf.mxu1 }
 0x666   :  { %2542 = vtanh.f32 %v492_v7  ;;  %v2109_v12 = vmul.f32 -1.442695, %v492_v7  ;;  %v2928_v7 = vpop.f32.mrf.mxu0  ;;  %v187_v8 = vadd.f32 %v2307_v46, %v2822_v26 }
 0x668   :  { %2544 = vpow2.f32 %v2109_v12 }
 0x673   :  { %v2543_v10 = vpop.eup %2542 }
 0x674   :  { %502 = vrot.lane.b32.xlu0 %v2543_v10, %s2704_s11 }
 0x675   :  { %v2545_v13 = vpop.eup %2544 }
 0x676   :  { %v496_v14 = vadd.f32 1.0, %v2545_v13 }
 0x678   :  { %2546 = vrcp.f32 %v496_v14 }
 0x685   :  { %v2547_v15 = vpop.eup %2546 }
 0x686   :  { %v500_v18 = vmul.f32 %v2547_v15, %v405_v57 }
 0x6e6   :  { %v503_v16 = vpop.permute.xlu0 %502 }
 0x6e7   :  { %v505_v17 = vmul.f32 %v2547_v15, %v503_v16 }
 0x6e9   :  { %507 = vrot.lane.b32.xlu1 %v505_v17, %s2705_s12 }
 0x75b   :  { %v508_v19 = vpop.permute.xlu1 %507 }
 0x75c   :  { %v510_v20 = vadd.f32 %v508_v19, %v500_v18 }
 0x75e   :  { %2548 = vtanh.f32 %v510_v20 }
 0x76b   :  { %v2549_v21 = vpop.eup %2548 }
 0x76c   :  { %513 = vrot.lane.b32.xlu0 %v2549_v21, %s2704_s11  ;;  %v1059_v21 = vld [vmem:[%s3159_s4 + $0x18] sm:$0xff] }
 0x7de   :  { %v514_v22 = vpop.permute.xlu0 %513 }
 0x7df   :  { %v516_v23 = vmul.f32 %v2547_v15, %v514_v22 }
 0x7e1   :  { %518 = vrot.lane.b32.xlu1 %v516_v23, %s2705_s12 }
 0x853   :  { %v519_v24 = vpop.permute.xlu1 %518 }
 0x854   :  { %522 = vst.msk [vmem:[#allocation3 + $0x10] sm:$0xff] %vm209_vm1, %v519_v24  ;;  %2353 = vmatmul.mubr.msk.f32.vlgmr.msra.gmra.mxu1 %vm209_vm1, %v519_v24 }
 0x855   :  { %2356 = vmatpush3.msra.mxu1 %v2768_v5  ;;  %2363 = vmatprep.mubr.msk.f32.mxu1 %vm2703_vm0, %v2702_v0 }
 0x856   :  { %2357 = vmatprep.subr.mxu1 %v2702_v0 }
 0x857   :  { %2358 = vmatpush3.msra.mxu1 %v2774_v6 }
 0x858   :  { %2359 = vmatprep.subr.mxu1 %v2702_v0 }
 0x859   :  { %2360 = vmatpush3.msra.mxu1 %v2784_v9 }
 0x85a   :  { %2361 = vmatprep.subr.mxu1 %v2702_v0 }
 0x85b   :  { %2362 = vmatpush3.msra.mxu1 %v2790_v11 }
 0x85c   :  { %2377 = vmatprep.subr.mxu1 %v2702_v0 }
 0x914   :  { %v593_v27 = vpop.f32.mrf.mxu1 }
 0x915   :  { %v597_v28 = vadd.f32 %v593_v27, %v177_v25  ;;  %v1058_v27 = vld [vmem:[%s3159_s4 + $0x10] sm:$0xff] }
 0x916   :  { %v2354_v29 = vpop.f32.mrf.mxu1 }
 0x917   :  { %2550 = vtanh.f32 %v597_v28  ;;  %v2111_v31 = vmul.f32 -1.442695, %v597_v28  ;;  %v1048_v28 = vld [vmem:[#allocation3] sm:$0xff]  ;;  %v1057_v29 = vld [vmem:[%s3159_s4 + $0x8] sm:$0xff] }
 0x919   :  { %2552 = vpow2.f32 %v2111_v31  ;;  %v1049_v31 = vld [vmem:[#allocation3 + $0x8] sm:$0xff] }
 0x924   :  { %v2551_v30 = vpop.eup %2550 }
 0x925   :  { %607 = vrot.lane.b32.xlu0 %v2551_v30, %s2704_s11  ;;  %v1056_v30 = vld [vmem:[%s3159_s4] sm:$0xff] }
 0x926   :  { %v2553_v32 = vpop.eup %2552 }
 0x927   :  { %v601_v33 = vadd.f32 1.0, %v2553_v32  ;;  %v1050_v32 = vld [vmem:[#allocation3 + $0x10] sm:$0xff] }
 0x929   :  { %2554 = vrcp.f32 %v601_v33 }
 0x936   :  { %v2555_v34 = vpop.eup %2554 }
 0x937   :  { %v605_v37 = vmul.f32 %v2555_v34, %v510_v20 }
 0x997   :  { %v608_v35 = vpop.permute.xlu0 %607 }
 0x998   :  { %v610_v36 = vmul.f32 %v2555_v34, %v608_v35 }
 0x99a   :  { %612 = vrot.lane.b32.xlu1 %v610_v36, %s2705_s12 }
 0xa0c   :  { %v613_v38 = vpop.permute.xlu1 %612 }
 0xa0d   :  { %v615_v39 = vadd.f32 %v613_v38, %v605_v37 }
 0xa0f   :  { %2556 = vtanh.f32 %v615_v39 }
 0xa1c   :  { %v2557_v42 = vpop.eup %2556 }
 0xa1d   :  { %618 = vrot.lane.b32.xlu0 %v2557_v42, %s2704_s11 }
 0xa8f   :  { %v619_v43 = vpop.permute.xlu0 %618 }
 0xa90   :  { %v621_v44 = vmul.f32 %v2555_v34, %v619_v43 }
 0xa92   :  { %623 = vrot.lane.b32.xlu1 %v621_v44, %s2705_s12 }
 0xb04   :  { %v624_v45 = vpop.permute.xlu1 %623 }
 0xb05   :  { %627 = vst.msk [vmem:[#allocation3 + $0x18] sm:$0xff] %vm209_vm1, %v624_v45  ;;  %2364 = vmatmul.mubr.msk.f32.vlgmr.msra.gmra.mxu1 %vm209_vm1, %v624_v45 }
 0xb06   :  { %2378 = vmatpush3.msra.mxu1 %v2768_v5  ;;  %2385 = vmatprep.mubr.msk.f32.mxu1 %vm2703_vm0, %v2702_v0 }
 0xb07   :  { %2379 = vmatprep.subr.mxu1 %v2702_v0 }
 0xb08   :  { %2380 = vmatpush3.msra.mxu1 %v2774_v6 }
 0xb09   :  { %2381 = vmatprep.subr.mxu1 %v2702_v0 }
 0xb0a   :  { %2382 = vmatpush3.msra.mxu1 %v2784_v9 }
 0xb0b   :  { %2383 = vmatprep.subr.mxu1 %v2702_v0 }
 0xb0c   :  { %2384 = vmatpush3.msra.mxu1 %v2790_v11  ;;  %v1051_v33 = vld [vmem:[#allocation3 + $0x18] sm:$0xff] }
 0xb0d   :  { %2399 = vmatprep.subr.mxu1 %v1059_v21 }
 0xbc5   :  { %v698_v49 = vpop.f32.mrf.mxu1 }
 0xbc6   :  { %v702_v50 = vadd.f32 %v698_v49, %v182_v48 }
 0xbc7   :  { %v2365_v51 = vpop.f32.mrf.mxu1 }
 0xbc8   :  { %2558 = vtanh.f32 %v702_v50  ;;  %v2113_v53 = vmul.f32 -1.442695, %v702_v50  ;;  %v2966_v51 = vld [vmem:[%s3160_s5 + $0x18] sm:$0xff] }
 0xbca   :  { %2560 = vpow2.f32 %v2113_v53  ;;  %v2979_v53 = vld [vmem:[%s3160_s5 + $0x8] sm:$0xff] }
 0xbd5   :  { %v2559_v52 = vpop.eup %2558 }
 0xbd6   :  { %712 = vrot.lane.b32.xlu0 %v2559_v52, %s2704_s11  ;;  %v2972_v52 = vld [vmem:[%s3160_s5 + $0x10] sm:$0xff] }
 0xbd7   :  { %v2561_v54 = vpop.eup %2560 }
 0xbd8   :  { %v706_v55 = vadd.f32 1.0, %v2561_v54  ;;  %v2986_v54 = vld [vmem:[%s3160_s5] sm:$0xff] }
 0xbda   :  { %2562 = vrcp.f32 %v706_v55 }
 0xbe7   :  { %v2563_v56 = vpop.eup %2562 }
 0xbe8   :  { %v710_v59 = vmul.f32 %v2563_v56, %v615_v39 }
 0xc48   :  { %v713_v57 = vpop.permute.xlu0 %712 }
 0xc49   :  { %v715_v58 = vmul.f32 %v2563_v56, %v713_v57 }
 0xc4b   :  { %717 = vrot.lane.b32.xlu1 %v715_v58, %s2705_s12 }
 0xcbd   :  { %v718_v60 = vpop.permute.xlu1 %717 }
 0xcbe   :  { %v720_v61 = vadd.f32 %v718_v60, %v710_v59  ;;  %v197_v59 = vadd.f32 %v2928_v7, %v2822_v26 }
 0xcc0   :  { %2564 = vtanh.f32 %v720_v61 }
 0xccd   :  { %v2565_v1 = vpop.eup %2564 }
 0xcce   :  { %723 = vrot.lane.b32.xlu0 %v2565_v1, %s2704_s11 }
 0xd40   :  { %v724_v2 = vpop.permute.xlu0 %723 }
 0xd41   :  { %v726_v3 = vmul.f32 %v2563_v56, %v724_v2  ;;  %v3023_v2 = vld [vmem:[%s3161_s6] ss:$0 sm:$0xff] }
 0xd43   :  { %728 = vrot.lane.b32.xlu1 %v726_v3, %s2705_s12 }
 0xdb5   :  { %v729_v4 = vpop.permute.xlu1 %728 }
 0xdb6   :  { %732 = vst.msk [vmem:[#allocation3 + $0x20] sm:$0xff] %vm209_vm1, %v729_v4  ;;  %2375 = vmatmul.mubr.msk.f32.vlgmr.msra.gmra.mxu0 %vm209_vm1, %v729_v4 }
 0xdb7   :  { %2389 = vmatpush3.msra.mxu0 %v2768_v5  ;;  %2396 = vmatprep.mubr.msk.f32.mxu0 %vm2703_vm0, %v2702_v0  ;;  %v191_v5 = vpop.f32.mrf.mxu0 }
 0xdb8   :  { %2390 = vmatprep.subr.mxu0 %v2702_v0  ;;  %v192_v36 = vadd.f32 %v2822_v26, %v191_v5 }
 0xdb9   :  { %2391 = vmatpush3.msra.mxu0 %v2774_v6 }
 0xdba   :  { %2392 = vmatprep.subr.mxu0 %v2702_v0 }
 0xdbb   :  { %2393 = vmatpush3.msra.mxu0 %v2784_v9 }
 0xdbc   :  { %2394 = vmatprep.subr.mxu0 %v2702_v0 }
 0xdbd   :  { %2395 = vmatpush3.msra.mxu0 %v2790_v11  ;;  %v1052_v34 = vld [vmem:[#allocation3 + $0x20] sm:$0xff] }
 0xdbe   :  { %2419 = vmatprep.subr.mxu0 %v2702_v0 }
 0xe76   :  { %v803_v10 = vpop.f32.mrf.mxu0 }
 0xe77   :  { %v807_v12 = vadd.f32 %v803_v10, %v187_v8 }
 0xe78   :  { %v2376_v13 = vpop.f32.mrf.mxu0 }
 0xe79   :  { %2566 = vtanh.f32 %v807_v12  ;;  %v2115_v14 = vmul.f32 -1.442695, %v807_v12 }
 0xe7b   :  { %2568 = vpow2.f32 %v2115_v14 }
 0xe86   :  { %v2567_v6 = vpop.eup %2566 }
 0xe87   :  { %817 = vrot.lane.b32.xlu0 %v2567_v6, %s2704_s11 }
 0xe88   :  { %v2569_v9 = vpop.eup %2568 }
 0xe89   :  { %v811_v15 = vadd.f32 1.0, %v2569_v9 }
 0xe8b   :  { %2570 = vrcp.f32 %v811_v15 }
 0xe98   :  { %v2571_v11 = vpop.eup %2570 }
 0xe99   :  { %v815_v18 = vmul.f32 %v2571_v11, %v720_v61 }
 0xef9   :  { %v818_v16 = vpop.permute.xlu0 %817 }
 0xefa   :  { %v820_v17 = vmul.f32 %v2571_v11, %v818_v16 }
 0xefc   :  { %822 = vrot.lane.b32.xlu1 %v820_v17, %s2705_s12 }
 0xf6e   :  { %v823_v19 = vpop.permute.xlu1 %822 }
 0xf6f   :  { %v825_v20 = vadd.f32 %v823_v19, %v815_v18 }
 0xf71   :  { %2572 = vtanh.f32 %v825_v20 }
 0xf7e   :  { %v2573_v22 = vpop.eup %2572 }
 0xf7f   :  { %828 = vrot.lane.b32.xlu0 %v2573_v22, %s2704_s11 }
 0xff1   :  { %v829_v23 = vpop.permute.xlu0 %828 }
 0xff2   :  { %v831_v24 = vmul.f32 %v2571_v11, %v829_v23 }
 0xff4   :  { %833 = vrot.lane.b32.xlu1 %v831_v24, %s2705_s12 }
0x1066   :  { %v834_v25 = vpop.permute.xlu1 %833 }
0x1067   :  { %837 = vst.msk [vmem:[#allocation3 + $0x28] sm:$0xff] %vm209_vm1, %v834_v25  ;;  %2386 = vmatmul.mubr.msk.f32.vlgmr.msra.gmra.mxu1 %vm209_vm1, %v834_v25 }
0x1068   :  { %2400 = vmatpush3.msra.mxu1 %v1059_v21  ;;  %2407 = vmatprep.mubr.msk.f32.mxu1 %vm209_vm1, %v1048_v28 }
0x1069   :  { %2401 = vmatprep.subr.mxu1 %v1058_v27 }
0x106a   :  { %2402 = vmatpush3.msra.mxu1 %v1058_v27 }
0x106b   :  { %2403 = vmatprep.subr.mxu1 %v1057_v29 }
0x106c   :  { %2404 = vmatpush3.msra.mxu1 %v1057_v29 }
0x106d   :  { %2405 = vmatprep.subr.mxu1 %v1056_v30 }
0x106e   :  { %2406 = vmatpush3.msra.mxu1 %v1056_v30  ;;  %v1053_v35 = vld [vmem:[#allocation3 + $0x28] sm:$0xff] }
0x106f   :  { %2408 = vmatmul.mubr.msk.f32.vlgmr.msra.gmra.mxu1 %vm209_vm1, %v1049_v31  ;;  %2441 = vmatprep.subr.mxu1 %v2702_v0 }
0x1070   :  { %2410 = vmatprep.mubr.msk.f32.mxu1 %vm209_vm1, %v1050_v32  ;;  %2442 = vmatpush3.msra.mxu1 %v2966_v51 }
0x1071   :  { %2443 = vmatprep.subr.mxu1 %v2702_v0 }
0x1072   :  { %2444 = vmatpush3.msra.mxu1 %v2972_v52 }
0x1073   :  { %2411 = vmatmul.mubr.msk.f32.gmra.mxu1 %vm209_vm1, %v1051_v33  ;;  %2445 = vmatprep.subr.mxu1 %v2702_v0 }
0x1074   :  { %2413 = vmatprep.mubr.msk.f32.mxu1 %vm209_vm1, %v1052_v34  ;;  %2446 = vmatpush3.msra.mxu1 %v2979_v53 }
0x1075   :  { %2447 = vmatprep.subr.mxu1 %v2702_v0 }
0x1076   :  { %2448 = vmatpush3.msra.mxu1 %v2986_v54 }
0x1077   :  { %2414 = vmatmul.mubr.msk.f32.gmra.mxu1 %vm209_vm1, %v1053_v35  ;;  %2463 = vmatprep.subr.mxu1 %v2702_v0 }
0x1127   :  { %v908_v37 = vpop.f32.mrf.mxu1 }
0x1128   :  { %v912_v38 = vadd.f32 %v908_v37, %v192_v36 }
0x1129   :  { %v2387_v39 = vpop.f32.mrf.mxu1 }
0x112a   :  { %2574 = vtanh.f32 %v912_v38  ;;  %v2117_v41 = vmul.f32 -1.442695, %v912_v38 }
0x112c   :  { %2576 = vpow2.f32 %v2117_v41 }
0x112f   :  { %v3018_v60 = vpop.f32.mrf.mxu1 }
0x1130   :  { %v1167_v34 = vadd.f32 %v3018_v60, %v3023_v2 }
0x1131   :  { %v1161_v1 = vpop.f32.mrf.mxu1 }
0x1132   :  { %v1162_v3 = vadd.f32 %v3023_v2, %v1161_v1 }
0x1137   :  { %v2575_v40 = vpop.eup %2574 }
0x1138   :  { %922 = vrot.lane.b32.xlu0 %v2575_v40, %s2704_s11 }
0x1139   :  { %v2577_v42 = vpop.eup %2576 }
0x113a   :  { %v916_v43 = vadd.f32 1.0, %v2577_v42 }
0x113c   :  { %2578 = vrcp.f32 %v916_v43 }
0x1149   :  { %v2579_v44 = vpop.eup %2578 }
0x114a   :  { %v920_v47 = vmul.f32 %v2579_v44, %v825_v20 }
0x11aa   :  { %v923_v45 = vpop.permute.xlu0 %922 }
0x11ab   :  { %v925_v46 = vmul.f32 %v2579_v44, %v923_v45 }
0x11ad   :  { %927 = vrot.lane.b32.xlu1 %v925_v46, %s2705_s12 }
0x121f   :  { %v928_v48 = vpop.permute.xlu1 %927 }
0x1220   :  { %v2959_v49 = vadd.f32 %v928_v48, %v920_v47 }
0x1222   :  { %2580 = vtanh.f32 %v2959_v49 }
0x122f   :  { %v2581_v50 = vpop.eup %2580 }
0x1230   :  { %933 = vrot.lane.b32.xlu0 %v2581_v50, %s2704_s11 }
0x12a2   :  { %v934_v55 = vpop.permute.xlu0 %933 }
0x12a3   :  { %v936_v56 = vmul.f32 %v2579_v44, %v934_v55 }
0x12a5   :  { %938 = vrot.lane.b32.xlu1 %v936_v56, %s2705_s12 }
0x1317   :  { %v939_v57 = vpop.permute.xlu1 %938 }
0x1318   :  { %942 = vst.msk [vmem:[#allocation3 + $0x30] sm:$0xff] %vm209_vm1, %v939_v57  ;;  %2397 = vmatmul.mubr.msk.f32.vlgmr.msra.gmra.mxu0 %vm209_vm1, %v939_v57 }
0x1319   :  { %2420 = vmatpush3.msra.mxu0 %v2966_v51  ;;  %2427 = vmatprep.mubr.msk.f32.mxu0 %vm2703_vm0, %v2702_v0 }
0x131a   :  { %2421 = vmatprep.subr.mxu0 %v2702_v0 }
0x131b   :  { %2422 = vmatpush3.msra.mxu0 %v2972_v52 }
0x131c   :  { %2423 = vmatprep.subr.mxu0 %v2702_v0 }
0x131d   :  { %2424 = vmatpush3.msra.mxu0 %v2979_v53 }
0x131e   :  { %2425 = vmatprep.subr.mxu0 %v2702_v0 }
0x131f   :  { %2426 = vmatpush3.msra.mxu0 %v2986_v54  ;;  %v1054_v58 = vld [vmem:[#allocation3 + $0x30] sm:$0xff] }
0x1320   :  { %2428 = vmatmul.mubr.f32.vlgmr.msra.gmra.mxu0 %v2702_v0  ;;  %2416 = vmatprep.mubr.msk.f32.mxu1 %vm209_vm1, %v1054_v58  ;;  %v2412_v58 = vpop.f32.mrf.mxu1 }
0x1321   :  { %2430 = vmatprep.subr.mxu0 %v2702_v0  ;;  %2438 = vmatprep.mubr.msk.f32.mxu0 %vm2703_vm0, %v2702_v0 }
0x1322   :  { %2431 = vmatpush3.msra.mxu0 %v2966_v51 }
0x1323   :  { %2432 = vmatprep.subr.mxu0 %v2702_v0 }
0x1324   :  { %2433 = vmatpush3.msra.mxu0 %v2972_v52 }
0x1325   :  { %2434 = vmatprep.subr.mxu0 %v2702_v0 }
0x1326   :  { %2435 = vmatpush3.msra.mxu0 %v2979_v53 }
0x1327   :  { %2436 = vmatprep.subr.mxu0 %v2702_v0 }
0x1328   :  { %2437 = vmatpush3.msra.mxu0 %v2986_v54 }
0x1329   :  { %2452 = vmatprep.subr.mxu0 %v2702_v0 }
0x13d8   :  { %v1013_v61 = vpop.f32.mrf.mxu0 }
0x13d9   :  { %v1017_v62 = vadd.f32 %v1013_v61, %v197_v59  ;;  %v1171_v59 = vpop.f32.mrf.mxu1 }
0x13da   :  { %v2398_v63 = vpop.f32.mrf.mxu0  ;;  %v1172_v1 = vadd.f32 %v3023_v2, %v1171_v59 }
0x13db   :  { %v2119_v18 = vmul.f32 -1.442695, %v1017_v62  ;;  %v3067_v60 = vpop.f32.mrf.mxu1 }
0x13dd   :  { %v3069_v61 = vpop.f32.mrf.mxu1 }
0x13e0   :  { %v1275_v4 = vpop.f32.mrf.mxu0 }
0x13e1   :  { %v1279_v5 = vadd.f32 %v1275_v4, %v1162_v3 }
0x13e2   :  { %v2429_v8 = vpop.f32.mrf.mxu0 }
0x13e3   :  { %2582 = vtanh.f32 %v1279_v5  ;;  %v2129_v26 = vmul.f32 -1.442695, %v1279_v5 }
0x13e5   :  { %2584 = vpow2.f32 %v2129_v26 }
0x13f0   :  { %v2583_v10 = vpop.eup %2582 }
0x13f1   :  { %1289 = vrot.lane.b32.xlu0 %v2583_v10, %s2704_s11 }
0x13f2   :  { %v2585_v7 = vpop.eup %2584 }
0x13f3   :  { %v1283_v12 = vadd.f32 1.0, %v2585_v7 }
0x13f5   :  { %2586 = vrcp.f32 %v1283_v12 }
0x1402   :  { %v2587_v13 = vpop.eup %2586 }
0x1403   :  { %v1287_v9 = vmul.f32 0.0, %v2587_v13 }
0x1463   :  { %v1290_v6 = vpop.permute.xlu0 %1289 }
0x1464   :  { %v1292_v14 = vmul.f32 %v2587_v13, %v1290_v6 }
0x1466   :  { %1294 = vrot.lane.b32.xlu1 %v1292_v14, %s2705_s12 }
0x14d8   :  { %v1295_v15 = vpop.permute.xlu1 %1294 }
0x14d9   :  { %v1297_v11 = vadd.f32 %v1295_v15, %v1287_v9 }
0x14db   :  { %2588 = vtanh.f32 %v1297_v11 }
0x14dc   :  { %2590 = vtanh.f32 %v1017_v62 }
0x14dd   :  { %2592 = vpow2.f32 %v2119_v18 }
0x14e8   :  { %v2589_v16 = vpop.eup %2588 }
0x14e9   :  { %1300 = vrot.lane.b32.xlu0 %v2589_v16, %s2704_s11  ;;  %v2591_v17 = vpop.eup %2590 }
0x14ea   :  { %v2593_v19 = vpop.eup %2592 }
0x14eb   :  { %v1021_v20 = vadd.f32 1.0, %v2593_v19  ;;  %v1177_v19 = vadd.f32 %v2412_v58, %v3023_v2 }
0x14ed   :  { %1027 = vrot.lane.b32.xlu0 %v2591_v17, %s2704_s11  ;;  %2594 = vrcp.f32 %v1021_v20 }
0x14fa   :  { %v2595_v23 = vpop.eup %2594 }
0x14fb   :  { %v1025_v28 = vmul.f32 %v2595_v23, %v2959_v49 }
0x155b   :  { %v1301_v21 = vpop.permute.xlu0 %1300 }
0x155c   :  { %v1303_v22 = vmul.f32 %v2587_v13, %v1301_v21 }
0x155e   :  { %1306 = vrot.lane.b32.xlu1 %v1303_v22, %s2705_s12 }
0x155f   :  { %v1028_v24 = vpop.permute.xlu0 %1027 }
0x1560   :  { %v1030_v25 = vmul.f32 %v2595_v23, %v1028_v24 }
0x1562   :  { %1032 = vrot.lane.b32.xlu0 %v1030_v25, %s2705_s12 }
0x15d0   :  { %v1307_v27 = vpop.permute.xlu1 %1306 }
0x15d1   :  { %2439 = vmatmul.mubr.msk.f32.vlgmr.msra.gmra.mxu0 %vm209_vm1, %v1307_v27 }
0x15d2   :  { %2453 = vmatpush3.msra.mxu0 %v2966_v51  ;;  %2460 = vmatprep.mubr.msk.f32.mxu0 %vm2703_vm0, %v2702_v0 }
0x15d3   :  { %2454 = vmatprep.subr.mxu0 %v2702_v0 }
0x15d4   :  { %v1033_v29 = vpop.permute.xlu0 %1032  ;;  %2455 = vmatpush3.msra.mxu0 %v2972_v52 }
0x15d5   :  { %v1035_v30 = vadd.f32 %v1033_v29, %v1025_v28  ;;  %2456 = vmatprep.subr.mxu0 %v2702_v0 }
0x15d6   :  { %2457 = vmatpush3.msra.mxu0 %v2979_v53 }
0x15d7   :  { %2596 = vtanh.f32 %v1035_v30  ;;  %2458 = vmatprep.subr.mxu0 %v2702_v0 }
0x15d8   :  { %2459 = vmatpush3.msra.mxu0 %v2986_v54 }
0x15d9   :  { %2474 = vmatprep.subr.mxu0 %v2702_v0 }
0x15e4   :  { %v2597_v31 = vpop.eup %2596 }
0x15e5   :  { %1038 = vrot.lane.b32.xlu0 %v2597_v31, %s2704_s11 }
0x1657   :  { %v1039_v32 = vpop.permute.xlu0 %1038 }
0x1658   :  { %v1041_v33 = vmul.f32 %v2595_v23, %v1039_v32 }
0x165a   :  { %1043 = vrot.lane.b32.xlu0 %v1041_v33, %s2705_s12 }
0x1691   :  { %v1376_v35 = vpop.f32.mrf.mxu0 }
0x1692   :  { %v1380_v36 = vadd.f32 %v1376_v35, %v1167_v34 }
0x1693   :  { %v2440_v37 = vpop.f32.mrf.mxu0 }
0x1694   :  { %2598 = vtanh.f32 %v1380_v36  ;;  %v2131_v41 = vmul.f32 -1.442695, %v1380_v36 }
0x1696   :  { %2600 = vpow2.f32 %v2131_v41 }
0x16a1   :  { %v2599_v38 = vpop.eup %2598 }
0x16a2   :  { %1390 = vrot.lane.b32.xlu1 %v2599_v38, %s2704_s11  ;;  %v1182_v38 = vadd.f32 %v3023_v2, %v3069_v61  ;;  %v1187_v61 = vadd.f32 %v3067_v60, %v3023_v2 }
0x16a3   :  { %v2601_v42 = vpop.eup %2600 }
0x16a4   :  { %v1384_v43 = vadd.f32 1.0, %v2601_v42 }
0x16a6   :  { %2602 = vrcp.f32 %v1384_v43 }
0x16b3   :  { %v2603_v44 = vpop.eup %2602 }
0x16b4   :  { %v1388_v47 = vmul.f32 %v2603_v44, %v1297_v11 }
0x16cc   :  { %v1044_v39 = vpop.permute.xlu0 %1043 }
0x16cd   :  { %1047 = vst.msk [vmem:[#allocation3 + $0x38] sm:$0xff] %vm209_vm1, %v1044_v39 }
0x16d4   :  { %v1055_v40 = vld [vmem:[#allocation3 + $0x38] sm:$0xff] }
0x16d5   :  { %2417 = vmatmul.mubr.msk.f32.gmra.mxu1 %vm209_vm1, %v1055_v40 }
0x16d6   :  { %2449 = vmatprep.mubr.msk.f32.mxu1 %vm2703_vm0, %v2702_v0 }
0x1714   :  { %v1391_v45 = vpop.permute.xlu1 %1390 }
0x1715   :  { %v1393_v46 = vmul.f32 %v2603_v44, %v1391_v45 }
0x1717   :  { %1395 = vrot.lane.b32.xlu1 %v1393_v46, %s2705_s12 }
0x1789   :  { %v1396_v48 = vpop.permute.xlu1 %1395 }
0x178a   :  { %v1398_v49 = vadd.f32 %v1396_v48, %v1388_v47 }
0x178c   :  { %2604 = vtanh.f32 %v1398_v49 }
0x1795   :  { %v3071_v62 = vpop.f32.mrf.mxu1 }
0x1797   :  { %v3073_v63 = vpop.f32.mrf.mxu1 }
0x1799   :  { %v2605_v50 = vpop.eup %2604 }
0x179a   :  { %1401 = vrot.lane.b32.xlu1 %v2605_v50, %s2704_s11 }
0x180c   :  { %v1402_v55 = vpop.permute.xlu1 %1401 }
0x180d   :  { %v1404_v56 = vmul.f32 %v2603_v44, %v1402_v55 }
0x180f   :  { %1407 = vrot.lane.b32.xlu1 %v1404_v56, %s2705_s12 }
0x1881   :  { %v1408_v57 = vpop.permute.xlu1 %1407 }
0x1882   :  { %2450 = vmatmul.mubr.msk.f32.vlgmr.msra.gmra.mxu1 %vm209_vm1, %v1408_v57 }
0x1883   :  { %2464 = vmatpush3.msra.mxu1 %v2966_v51  ;;  %2471 = vmatprep.mubr.msk.f32.mxu1 %vm2703_vm0, %v2702_v0 }
0x1884   :  { %2465 = vmatprep.subr.mxu1 %v2702_v0 }
0x1885   :  { %2466 = vmatpush3.msra.mxu1 %v2972_v52 }
0x1886   :  { %2467 = vmatprep.subr.mxu1 %v2702_v0 }
0x1887   :  { %2468 = vmatpush3.msra.mxu1 %v2979_v53 }
0x1888   :  { %2469 = vmatprep.subr.mxu1 %v2702_v0 }
0x1889   :  { %2470 = vmatpush3.msra.mxu1 %v2986_v54 }
0x188a   :  { %2485 = vmatprep.subr.mxu1 %v2702_v0 }
0x1942   :  { %v1477_v3 = vpop.f32.mrf.mxu1 }
0x1943   :  { %v1481_v4 = vadd.f32 %v1477_v3, %v1172_v1 }
0x1944   :  { %v2451_v5 = vpop.f32.mrf.mxu1 }
0x1945   :  { %2606 = vtanh.f32 %v1481_v4  ;;  %v2133_v10 = vmul.f32 -1.442695, %v1481_v4 }
0x1947   :  { %2608 = vpow2.f32 %v2133_v10 }
0x1952   :  { %v2607_v8 = vpop.eup %2606 }
0x1953   :  { %1491 = vrot.lane.b32.xlu0 %v2607_v8, %s2704_s11 }
0x1954   :  { %v2609_v26 = vpop.eup %2608 }
0x1955   :  { %v1485_v7 = vadd.f32 1.0, %v2609_v26 }
0x1957   :  { %2610 = vrcp.f32 %v1485_v7 }
0x1964   :  { %v2611_v12 = vpop.eup %2610 }
0x1965   :  { %v1489_v14 = vmul.f32 %v2611_v12, %v1398_v49 }
0x19c5   :  { %v1492_v13 = vpop.permute.xlu0 %1491 }
0x19c6   :  { %v1494_v6 = vmul.f32 %v2611_v12, %v1492_v13 }
0x19c8   :  { %1496 = vrot.lane.b32.xlu1 %v1494_v6, %s2705_s12 }
0x1a3a   :  { %v1497_v9 = vpop.permute.xlu1 %1496 }
0x1a3b   :  { %v1499_v15 = vadd.f32 %v1497_v9, %v1489_v14  ;;  %v1192_v9 = vadd.f32 %v3023_v2, %v3073_v63 }
0x1a3d   :  { %2612 = vtanh.f32 %v1499_v15 }
0x1a4a   :  { %v2613_v11 = vpop.eup %2612 }
0x1a4b   :  { %1502 = vrot.lane.b32.xlu0 %v2613_v11, %s2704_s11 }
0x1abd   :  { %v1503_v16 = vpop.permute.xlu0 %1502 }
0x1abe   :  { %v1505_v17 = vmul.f32 %v2611_v12, %v1503_v16 }
0x1ac0   :  { %1508 = vrot.lane.b32.xlu1 %v1505_v17, %s2705_s12 }
0x1b32   :  { %v1509_v18 = vpop.permute.xlu1 %1508 }
0x1b33   :  { %2461 = vmatmul.mubr.msk.f32.vlgmr.msra.gmra.mxu0 %vm209_vm1, %v1509_v18 }
0x1b34   :  { %2475 = vmatpush3.msra.mxu0 %v2966_v51  ;;  %2482 = vmatprep.mubr.msk.f32.mxu0 %vm2703_vm0, %v2702_v0 }
0x1b35   :  { %2476 = vmatprep.subr.mxu0 %v2702_v0 }
0x1b36   :  { %2477 = vmatpush3.msra.mxu0 %v2972_v52 }
0x1b37   :  { %2478 = vmatprep.subr.mxu0 %v2702_v0 }
0x1b38   :  { %2479 = vmatpush3.msra.mxu0 %v2979_v53 }
0x1b39   :  { %2480 = vmatprep.subr.mxu0 %v2702_v0 }
0x1b3a   :  { %2481 = vmatpush3.msra.mxu0 %v2986_v54 }
0x1b3b   :  { %2496 = vmatprep.subr.mxu0 %v2702_v0 }
0x1bf3   :  { %v1578_v20 = vpop.f32.mrf.mxu0 }
0x1bf4   :  { %v1582_v21 = vadd.f32 %v1578_v20, %v1177_v19 }
0x1bf5   :  { %v2462_v22 = vpop.f32.mrf.mxu0 }
0x1bf6   :  { %2614 = vtanh.f32 %v1582_v21  ;;  %v2135_v24 = vmul.f32 -1.442695, %v1582_v21 }
0x1bf8   :  { %2616 = vpow2.f32 %v2135_v24 }
0x1c03   :  { %v2615_v23 = vpop.eup %2614 }
0x1c04   :  { %1592 = vrot.lane.b32.xlu0 %v2615_v23, %s2704_s11 }
0x1c05   :  { %v2617_v25 = vpop.eup %2616 }
0x1c06   :  { %v1586_v27 = vadd.f32 1.0, %v2617_v25 }
0x1c08   :  { %2618 = vrcp.f32 %v1586_v27 }
0x1c15   :  { %v2619_v28 = vpop.eup %2618 }
0x1c16   :  { %v1590_v31 = vmul.f32 %v2619_v28, %v1499_v15 }
0x1c76   :  { %v1593_v29 = vpop.permute.xlu0 %1592 }
0x1c77   :  { %v1595_v30 = vmul.f32 %v2619_v28, %v1593_v29 }
0x1c79   :  { %1597 = vrot.lane.b32.xlu1 %v1595_v30, %s2705_s12 }
0x1ceb   :  { %v1598_v32 = vpop.permute.xlu1 %1597 }
0x1cec   :  { %v1600_v33 = vadd.f32 %v1598_v32, %v1590_v31  ;;  %v1197_v31 = vadd.f32 %v3071_v62, %v3023_v2  ;;  %v2014_v62 = vld [vmem:[#allocation7 + $0x18] sm:$0xff] }
0x1cee   :  { %2620 = vtanh.f32 %v1600_v33 }
0x1cfb   :  { %v2621_v34 = vpop.eup %2620 }
0x1cfc   :  { %1603 = vrot.lane.b32.xlu0 %v2621_v34, %s2704_s11 }
0x1d6e   :  { %v1604_v35 = vpop.permute.xlu0 %1603 }
0x1d6f   :  { %v1606_v36 = vmul.f32 %v2619_v28, %v1604_v35 }
0x1d71   :  { %1609 = vrot.lane.b32.xlu1 %v1606_v36, %s2705_s12 }
0x1de3   :  { %v1610_v37 = vpop.permute.xlu1 %1609 }
0x1de4   :  { %2472 = vmatmul.mubr.msk.f32.vlgmr.msra.gmra.mxu1 %vm209_vm1, %v1610_v37 }
0x1de5   :  { %2486 = vmatpush3.msra.mxu1 %v2966_v51  ;;  %2493 = vmatprep.mubr.msk.f32.mxu1 %vm2703_vm0, %v2702_v0 }
0x1de6   :  { %2487 = vmatprep.subr.mxu1 %v2702_v0 }
0x1de7   :  { %2488 = vmatpush3.msra.mxu1 %v2972_v52 }
0x1de8   :  { %2489 = vmatprep.subr.mxu1 %v2702_v0 }
0x1de9   :  { %2490 = vmatpush3.msra.mxu1 %v2979_v53 }
0x1dea   :  { %2491 = vmatprep.subr.mxu1 %v2702_v0 }
0x1deb   :  { %2492 = vmatpush3.msra.mxu1 %v2986_v54 }
0x1dec   :  { %2507 = vmatprep.subr.mxu1 %v2702_v0 }
0x1ea4   :  { %v1679_v39 = vpop.f32.mrf.mxu1 }
0x1ea5   :  { %v1683_v40 = vadd.f32 %v1679_v39, %v1182_v38 }
0x1ea6   :  { %v2473_v41 = vpop.f32.mrf.mxu1 }
0x1ea7   :  { %2622 = vtanh.f32 %v1683_v40  ;;  %v2137_v43 = vmul.f32 -1.442695, %v1683_v40 }
0x1ea9   :  { %2624 = vpow2.f32 %v2137_v43 }
0x1eb4   :  { %v2623_v42 = vpop.eup %2622 }
0x1eb5   :  { %1693 = vrot.lane.b32.xlu0 %v2623_v42, %s2704_s11 }
0x1eb6   :  { %v2625_v44 = vpop.eup %2624 }
0x1eb7   :  { %v1687_v45 = vadd.f32 1.0, %v2625_v44  ;;  %v2013_v44 = vld [vmem:[#allocation7 + $0x10] sm:$0xff] }
0x1eb9   :  { %2626 = vrcp.f32 %v1687_v45  ;;  %v2012_v45 = vld [vmem:[#allocation7 + $0x8] sm:$0xff] }
0x1ec6   :  { %v2627_v46 = vpop.eup %2626 }
0x1ec7   :  { %v1691_v49 = vmul.f32 %v2627_v46, %v1600_v33 }
0x1f27   :  { %v1694_v47 = vpop.permute.xlu0 %1693 }
0x1f28   :  { %v1696_v48 = vmul.f32 %v2627_v46, %v1694_v47 }
0x1f2a   :  { %1698 = vrot.lane.b32.xlu1 %v1696_v48, %s2705_s12 }
0x1f9c   :  { %v1699_v50 = vpop.permute.xlu1 %1698 }
0x1f9d   :  { %v1701_v55 = vadd.f32 %v1699_v50, %v1691_v49 }
0x1f9f   :  { %2628 = vtanh.f32 %v1701_v55 }
0x1fac   :  { %v2629_v56 = vpop.eup %2628 }
0x1fad   :  { %1704 = vrot.lane.b32.xlu0 %v2629_v56, %s2704_s11 }
0x201f   :  { %v1705_v57 = vpop.permute.xlu0 %1704 }
0x2020   :  { %v1707_v58 = vmul.f32 %v2627_v46, %v1705_v57  ;;  %v2011_v46 = vld [vmem:[#allocation7] sm:$0xff] }
0x2022   :  { %1710 = vrot.lane.b32.xlu1 %v1707_v58, %s2705_s12 }
0x2094   :  { %v1711_v59 = vpop.permute.xlu1 %1710 }
0x2095   :  { %2483 = vmatmul.mubr.msk.f32.vlgmr.msra.gmra.mxu0 %vm209_vm1, %v1711_v59 }
0x2096   :  { %2497 = vmatpush3.msra.mxu0 %v2966_v51  ;;  %2504 = vmatprep.mubr.msk.f32.mxu0 %vm2703_vm0, %v2702_v0 }
0x2097   :  { %2498 = vmatprep.subr.mxu0 %v2702_v0 }
0x2098   :  { %2499 = vmatpush3.msra.mxu0 %v2972_v52 }
0x2099   :  { %2500 = vmatprep.subr.mxu0 %v2702_v0 }
0x209a   :  { %2501 = vmatpush3.msra.mxu0 %v2979_v53 }
0x209b   :  { %2502 = vmatprep.subr.mxu0 %v2702_v0 }
0x209c   :  { %2503 = vmatpush3.msra.mxu0 %v2986_v54 }
0x2155   :  { %v1780_v1 = vpop.f32.mrf.mxu0 }
0x2156   :  { %v1784_v51 = vadd.f32 %v1780_v1, %v1187_v61 }
0x2157   :  { %v2484_v3 = vpop.f32.mrf.mxu0 }
0x2158   :  { %2630 = vtanh.f32 %v1784_v51  ;;  %v2139_v5 = vmul.f32 -1.442695, %v1784_v51 }
0x215a   :  { %2632 = vpow2.f32 %v2139_v5 }
0x2165   :  { %v2631_v4 = vpop.eup %2630 }
0x2166   :  { %1794 = vrot.lane.b32.xlu0 %v2631_v4, %s2704_s11 }
0x2167   :  { %v2633_v52 = vpop.eup %2632 }
0x2168   :  { %v1788_v8 = vadd.f32 1.0, %v2633_v52 }
0x216a   :  { %2634 = vrcp.f32 %v1788_v8 }
0x2177   :  { %v2635_v53 = vpop.eup %2634 }
0x2178   :  { %v1792_v54 = vmul.f32 %v2635_v53, %v1701_v55  ;;  %v2144_v55 = vld [vmem:[%s3163_s8] ss:$0 sm:$0xff] }
0x21d8   :  { %v1795_v10 = vpop.permute.xlu0 %1794 }
0x21d9   :  { %v1797_v26 = vmul.f32 %v2635_v53, %v1795_v10 }
0x21db   :  { %1799 = vrot.lane.b32.xlu1 %v1797_v26, %s2705_s12 }
0x224d   :  { %v1800_v7 = vpop.permute.xlu1 %1799 }
0x224e   :  { %v1802_v60 = vadd.f32 %v1800_v7, %v1792_v54 }
0x2250   :  { %2636 = vtanh.f32 %v1802_v60 }
0x225d   :  { %v2637_v12 = vpop.eup %2636 }
0x225e   :  { %1805 = vrot.lane.b32.xlu0 %v2637_v12, %s2704_s11 }
0x22d0   :  { %v1806_v13 = vpop.permute.xlu0 %1805 }
0x22d1   :  { %v1808_v6 = vmul.f32 %v2635_v53, %v1806_v13 }
0x22d3   :  { %1811 = vrot.lane.b32.xlu1 %v1808_v6, %s2705_s12 }
0x2345   :  { %v1812_v14 = vpop.permute.xlu1 %1811 }
0x2346   :  { %2494 = vmatmul.mubr.msk.f32.vlgmr.msra.gmra.mxu1 %vm209_vm1, %v1812_v14 }
0x2347   :  { %2515 = vmatprep.mubr.msk.f32.mxu1 %vm2703_vm0, %v2702_v0  ;;  %2508 = vmatpush3.msra.mxu1 %v2014_v62 }
0x2348   :  { %2509 = vmatprep.subr.mxu1 %v2702_v0 }
0x2349   :  { %2510 = vmatpush3.msra.mxu1 %v2013_v44 }
0x234a   :  { %2511 = vmatprep.subr.mxu1 %v2702_v0 }
0x234b   :  { %2512 = vmatpush3.msra.mxu1 %v2012_v45 }
0x234c   :  { %2513 = vmatprep.subr.mxu1 %v2702_v0 }
0x234d   :  { %2514 = vmatpush3.msra.mxu1 %v2011_v46 }
0x2406   :  { %v1881_v15 = vpop.f32.mrf.mxu1 }
0x2407   :  { %v1885_v11 = vadd.f32 %v1881_v15, %v1192_v9 }
0x2408   :  { %v2495_v16 = vpop.f32.mrf.mxu1 }
0x2409   :  { %2638 = vtanh.f32 %v1885_v11  ;;  %v2141_v18 = vmul.f32 -1.442695, %v1885_v11 }
0x240b   :  { %2640 = vpow2.f32 %v2141_v18 }
0x2416   :  { %v2639_v17 = vpop.eup %2638 }
0x2417   :  { %1895 = vrot.lane.b32.xlu0 %v2639_v17, %s2704_s11 }
0x2418   :  { %v2641_v19 = vpop.eup %2640 }
0x2419   :  { %v1889_v20 = vadd.f32 1.0, %v2641_v19 }
0x241b   :  { %2642 = vrcp.f32 %v1889_v20 }
0x2428   :  { %v2643_v21 = vpop.eup %2642 }
0x2429   :  { %v1893_v24 = vmul.f32 %v2643_v21, %v1802_v60 }
0x2489   :  { %v1896_v22 = vpop.permute.xlu0 %1895 }
0x248a   :  { %v1898_v23 = vmul.f32 %v2643_v21, %v1896_v22 }
0x248c   :  { %1900 = vrot.lane.b32.xlu1 %v1898_v23, %s2705_s12 }
0x24fe   :  { %v1901_v25 = vpop.permute.xlu1 %1900 }
0x24ff   :  { %v1903_v63 = vadd.f32 %v1901_v25, %v1893_v24 }
0x2501   :  { %2644 = vtanh.f32 %v1903_v63 }
0x250e   :  { %v2645_v27 = vpop.eup %2644 }
0x250f   :  { %1906 = vrot.lane.b32.xlu0 %v2645_v27, %s2704_s11 }
0x2581   :  { %v1907_v28 = vpop.permute.xlu0 %1906 }
0x2582   :  { %v1909_v29 = vmul.f32 %v2643_v21, %v1907_v28 }
0x2584   :  { %1912 = vrot.lane.b32.xlu1 %v1909_v29, %s2705_s12 }
0x25f6   :  { %v1913_v30 = vpop.permute.xlu1 %1912 }
0x25f7   :  { %2505 = vmatmul.mubr.msk.f32.vlgmr.msra.gmra.mxu0 %vm209_vm1, %v1913_v30 }
0x26b7   :  { %v1982_v32 = vpop.f32.mrf.mxu0 }
0x26b8   :  { %v1986_v33 = vadd.f32 %v1982_v32, %v1197_v31 }
0x26b9   :  { %v2506_v34 = vpop.f32.mrf.mxu0 }
0x26ba   :  { %2646 = vtanh.f32 %v1986_v33  ;;  %v2143_v36 = vmul.f32 -1.442695, %v1986_v33 }
0x26bc   :  { %2648 = vpow2.f32 %v2143_v36 }
0x26c7   :  { %v2647_v35 = vpop.eup %2646 }
0x26c8   :  { %1996 = vrot.lane.b32.xlu0 %v2647_v35, %s2704_s11 }
0x26c9   :  { %v2649_v37 = vpop.eup %2648 }
0x26ca   :  { %v1990_v38 = vadd.f32 1.0, %v2649_v37 }
0x26cc   :  { %2650 = vrcp.f32 %v1990_v38 }
0x26d9   :  { %v2651_v39 = vpop.eup %2650 }
0x26da   :  { %v1994_v42 = vmul.f32 %v2651_v39, %v1903_v63 }
0x273a   :  { %v1997_v40 = vpop.permute.xlu0 %1996 }
0x273b   :  { %v1999_v41 = vmul.f32 %v2651_v39, %v1997_v40 }
0x273d   :  { %2001 = vrot.lane.b32.xlu1 %v1999_v41, %s2705_s12 }
0x27af   :  { %v2002_v43 = vpop.permute.xlu1 %2001 }
0x27b0   :  { %v2004_v2 = vadd.f32 %v2002_v43, %v1994_v42 }
0x27b2   :  { %2652 = vtanh.f32 %v2004_v2 }
0x27bf   :  { %v2653_v47 = vpop.eup %2652 }
0x27c0   :  { %2007 = vrot.lane.b32.xlu0 %v2653_v47, %s2704_s11 }
0x2832   :  { %v2008_v48 = vpop.permute.xlu0 %2007 }
0x2833   :  { %v2010_v49 = vmul.f32 %v2651_v39, %v2008_v48 }
0x2835   :  { %2023 = vrot.lane.b32.xlu1 %v2010_v49, %s2705_s12 }
0x28a7   :  { %v2024_v50 = vpop.permute.xlu1 %2023 }
0x28a8   :  { %2516 = vmatmul.mubr.msk.f32.vlgmr.msra.gmra.mxu1 %vm209_vm1, %v2024_v50 }
0x2968   :  { %v2093_v56 = vpop.f32.mrf.mxu1 }
0x2969   :  { %v2094_v57 = vadd.f32 %v2144_v55, %v2093_v56 }
0x296a   :  { %v2517_v58 = vpop.f32.mrf.mxu1 }
0x296b   :  { %2097 = vst [vmem:[%s3164_s9] sm:$0xff] %v2094_v57 }
0x296c   :  { %2102 = vsyncpa [#allocation6], 1 }
0x296d   :  { %2103 = vsyncpa [#allocation8], 1 }

</bundles_post_ra>
